<compile_context>
chip_gen: v7x
topology: tpu7x:2x2x1
jax: 0.10.0
libtpu: 0.0.40
codegen_flags: <defaults>
</compile_context>

<pallas_src>
import jax
import jax.numpy as jnp
from jax.experimental import pallas as pl
from jax.experimental.pallas import tpu as pltpu

EPS = 1e-5  # nn.InstanceNorm2d default


def _vmem_limit_bytes():
    """Generation-gated VMEM budget: ~75% of physical, capped at 100 MiB."""
    try:
        cap = pltpu.get_tpu_info().vmem_capacity_bytes
    except Exception:
        cap = 64 * 1024 * 1024  # conservative (v7x-sized) fallback
    return int(min(cap * 3 // 4, 100 * 1024 * 1024))


def _make_residual_kernel(H, W, NB, compute_dtype, hoist_cast):
    """Fused conv3x3 -> IN -> ReLU -> conv3x3 -> IN -> (+x) kernel body."""
    HW = H * W
    inv_hw = 1.0 / HW

    def kernel(x_ref, w1_ref, w2_ref, o_ref):
        C = x_ref.shape[1]

        # Edge masks built in-kernel (no coords HBM input): one lane-iota plus
        # one remainder, reused by every tap of both convolutions.
        pos = jax.lax.broadcasted_iota(jnp.int32, (1, HW), 1)   # flat position
        col = pos % W                                           # column index
        not_top = pos >= W
        not_bot = pos < (H - 1) * W
        not_left = col > 0
        not_right = col < (W - 1)

        def tap_mask(dy, dx):
            ms = []
            if dy == 0:
                ms.append(not_top)
            if dy == 2:
                ms.append(not_bot)
            if dx == 0:
                ms.append(not_left)
            if dx == 2:
                ms.append(not_right)
            if not ms:
                return None
            m = ms[0]
            for extra in ms[1:]:
                m = jnp.logical_and(m, extra)
            return m

        masks = [[tap_mask(dy, dx) for dx in range(3)] for dy in range(3)]

        def conv3x3(y, w_ref):
            # 3x3 conv, padding=1: per kernel row, stack the 3 column-shifted
            # (and boundary-masked) taps along the K dim -> one (3C, HW)
            # operand, matmul'd against the pre-stacked (C, 3C) weight row.
            # Shifts are lane rotations (XLU); boundary reads are zeroed
            # (== zero padding).  No padded scratch, no zero-fill of acc.
            yc = y.astype(compute_dtype) if hoist_cast else y
            zero = jnp.zeros((), yc.dtype)
            acc = None
            for dy in range(3):
                taps = []
                for dx in range(3):
                    off = (dy - 1) * W + (dx - 1)    # tap[p] = y[p + off]
                    t = yc if off == 0 else pltpu.roll(yc, (-off) % HW, axis=1)
                    m = masks[dy][dx]
                    if m is not None:
                        t = jnp.where(m, t, zero)
                    taps.append(t)
                k_slab = jnp.concatenate(taps, axis=0)           # (3C, HW)
                part = jnp.dot(w_ref[dy], k_slab.astype(compute_dtype),
                               preferred_element_type=jnp.float32)
                acc = part if acc is None else acc + part
            return acc                                           # (C, HW) f32

        def instance_norm(z, relu):
            # Per-channel, per-image stats; one pass (sum + sum-of-squares),
            # var = E[x^2] - mean^2.  No concatenate / extra full-tile copies.
            s1 = jnp.sum(z, axis=1, keepdims=True)
            s2 = jnp.sum(z * z, axis=1, keepdims=True)
            mean = s1 * inv_hw
            var = jnp.maximum(s2 * inv_hw - mean * mean, 0.0)
            out = (z - mean) * jax.lax.rsqrt(var + EPS)
            return jnp.maximum(out, 0.0) if relu else out

        # One image at a time (loop over NB folded images in this grid step).
        for b in range(NB):
            x = x_ref[b].astype(jnp.float32)                     # (C, HW)
            y1 = instance_norm(conv3x3(x, w1_ref), relu=True)
            y2 = instance_norm(conv3x3(y1, w2_ref), relu=False)
            o_ref[b] = (x + y2).astype(o_ref.dtype)

    return kernel


def residual_block_nchw(x_nchw, w1_oihw, w2_oihw, *, batch_block=1,
                        compute_dtype=jnp.float32, hoist_cast=True):
    """ResidualBlock forward.

    x_nchw : (N, C, H, W) float32 (PyTorch layout)
    w*_oihw: (C, C, 3, 3)  float32 (PyTorch Conv2d weight layout)
    Conv biases are intentionally not taken: InstanceNorm(affine=False)
    cancels a per-channel bias exactly.
    compute_dtype=jnp.bfloat16 is recommended on v6e/v7x; on v5e also use
    bf16 but set hoist_cast=False (no bf16 VPU there).
    """
    N, C, H, W = x_nchw.shape
    assert N % batch_block == 0
    NB = batch_block
    G = N // NB
    HW = H * W

    # NCHW -> (N, C, HW): pure reshape, no HBM transpose.
    x = x_nchw.reshape(N, C, HW)

    # OIHW -> (3, C, 3C): row dy holds [w[:,:,dy,0] | w[:,:,dy,1] | w[:,:,dy,2]]
    # so each conv is 3 matmuls with K = 3C.  Stored in compute_dtype.
    def stack_rows(w):
        rows = [jnp.concatenate([w[:, :, dy, dx] for dx in range(3)], axis=1)
                for dy in range(3)]
        return jnp.stack(rows, axis=0).astype(compute_dtype)

    w1s = stack_rows(w1_oihw)
    w2s = stack_rows(w2_oihw)

    kernel = _make_residual_kernel(H, W, NB, compute_dtype, hoist_cast)

    wbytes = jnp.dtype(compute_dtype).itemsize
    cost = pl.CostEstimate(
        flops=2 * 2 * 9 * C * C * HW * N,            # 2 convs, 9 taps each
        transcendentals=2 * N * C,                   # rsqrt per IN channel
        bytes_accessed=2 * N * C * HW * x_nchw.dtype.itemsize
        + 2 * 9 * C * C * wbytes,
    )

    def call(single_buffer_weights):
        # Grid-invariant weight slabs: single buffer (double-buffering a
        # constant index_map buys nothing and wastes VMEM).
        wkw = dict(pipeline_mode=pl.Buffered(1)) if single_buffer_weights else {}
        return pl.pallas_call(
            kernel,
            out_shape=jax.ShapeDtypeStruct((N, C, HW), x_nchw.dtype),
            grid_spec=pltpu.PrefetchScalarGridSpec(
                num_scalar_prefetch=0,
                grid=(G,),
                in_specs=[
                    pl.BlockSpec((NB, C, HW), lambda g: (g, 0, 0)),          # x
                    pl.BlockSpec((3, C, 3 * C), lambda g: (0, 0, 0), **wkw),  # w1
                    pl.BlockSpec((3, C, 3 * C), lambda g: (0, 0, 0), **wkw),  # w2
                ],
                out_specs=pl.BlockSpec((NB, C, HW), lambda g: (g, 0, 0)),
            ),
            compiler_params=pltpu.CompilerParams(
                dimension_semantics=("parallel",),    # shard batch across TCs
                vmem_limit_bytes=_vmem_limit_bytes(),
            ),
            cost_estimate=cost,
        )(x, w1s, w2s)

    try:
        out = call(single_buffer_weights=True)
    except Exception:
        # Fallback for jax versions where pallas_call does not honor
        # BlockSpec.pipeline_mode: weights stay default double-buffered.
        out = call(single_buffer_weights=False)

    # (N, C, HW) -> NCHW: pure reshape.
    return out.reshape(N, C, H, W)


# --- pure-JAX reference (mirrors the PyTorch module, biases included) -------
def _ref_residual_block(x, w1, b1, w2, b2):
    def conv_block(y, w, b, relu):
        z = jax.lax.conv_general_dilated(
            y, w, window_strides=(1, 1), padding=((1, 1), (1, 1)),
            dimension_numbers=("NCHW", "OIHW", "NCHW"),
            precision=jax.lax.Precision.HIGHEST)
        z = z + b.reshape(1, -1, 1, 1)
        mean = jnp.mean(z, axis=(2, 3), keepdims=True)
        var = jnp.mean((z - mean) ** 2, axis=(2, 3), keepdims=True)
        z = (z - mean) * jax.lax.rsqrt(var + EPS)
        return jnp.maximum(z, 0.0) if relu else z

    y = conv_block(x, w1, b1, relu=True)
    y = conv_block(y, w2, b2, relu=False)
    return x + y


if __name__ == "__main__":
    N, C, H, W = 2, 4, 16, 16  # ResidualBlock(channels=4) at small spatial size

    key = jax.random.PRNGKey(0)
    kx, kw1, kb1, kw2, kb2 = jax.random.split(key, 5)

    x = jax.random.normal(kx, (N, C, H, W), dtype=jnp.float32)            # NCHW
    w1 = jax.random.normal(kw1, (C, C, 3, 3), dtype=jnp.float32) * 0.1    # OIHW
    b1 = jax.random.normal(kb1, (C,), dtype=jnp.float32) * 0.1
    w2 = jax.random.normal(kw2, (C, C, 3, 3), dtype=jnp.float32) * 0.1
    b2 = jax.random.normal(kb2, (C,), dtype=jnp.float32) * 0.1

    ref = jax.block_until_ready(_ref_residual_block(x, w1, b1, w2, b2))

    # 1) f32 path, one image per grid step (>=2 parallel steps for 2-TC chips).
    out = jax.block_until_ready(residual_block_nchw(x, w1, w2))
    assert out.shape == (N, C, H, W)
    assert jnp.allclose(out, ref, atol=2e-4, rtol=2e-4), \
        float(jnp.abs(out - ref).max())

    # 2) Whole batch folded into a single grid step (in-kernel per-image loop,
    #    no wrapper HBM transpose) -- also exercises the no-leakage invariant
    #    with distinct per-image data.
    out_fold = jax.block_until_ready(residual_block_nchw(x, w1, w2, batch_block=N))
    assert jnp.allclose(out_fold, ref, atol=2e-4, rtol=2e-4), \
        float(jnp.abs(out_fold - ref).max())

    # 3) bf16 MXU operands with hoisted cast (v6e/v7x path); IN math stays f32.
    out_bf16 = jax.block_until_ready(
        residual_block_nchw(x, w1, w2, compute_dtype=jnp.bfloat16))
    assert jnp.allclose(out_bf16, ref, atol=7.5e-2, rtol=7.5e-2), \
        float(jnp.abs(out_bf16 - ref).max())

    # 4) bf16 MXU operands, cast-at-dot (v5e path: rolls/masks stay f32).
    out_bf16_v5e = jax.block_until_ready(
        residual_block_nchw(x, w1, w2, compute_dtype=jnp.bfloat16,
                            hoist_cast=False))
    assert jnp.allclose(out_bf16_v5e, ref, atol=7.5e-2, rtol=7.5e-2), \
        float(jnp.abs(out_bf16_v5e - ref).max())

    print("KERNEL_OK")
</pallas_src>

<mosaic_0001>
module attributes {stable_mosaic.version = 11 : i64} {
  func.func @kernel(%arg0: i32, %arg1: memref<1x4x256xf32, #tpu.memory_space<vmem>>, %arg2: memref<3x4x12xf32, #tpu.memory_space<vmem>>, %arg3: memref<3x4x12xf32, #tpu.memory_space<vmem>>, %arg4: memref<1x4x256xf32, #tpu.memory_space<vmem>>) attributes {dimension_semantics = [#tpu.dimension_semantics<parallel>], iteration_bounds = array<i64: 2>, scalar_prefetch = 0 : i64, scratch_operands = 0 : i64, tpu.core_type = #tpu.core_type<tc>, window_params = [{transform_indices = @transform_0, window_bounds = array<i64: 1, 4, 256>}, {pipeline_mode = #tpu.pipeline_mode<synchronous>, transform_indices = @transform_1, window_bounds = array<i64: 3, 4, 12>}, {pipeline_mode = #tpu.pipeline_mode<synchronous>, transform_indices = @transform_2, window_bounds = array<i64: 3, 4, 12>}, {transform_indices = @transform_3, window_bounds = array<i64: 1, 4, 256>}]} {
    %0 = tpu.iota {dimensions = array<i32: 1>} : vector<1x256xi32>
    %c16_i32 = arith.constant 16 : i32
    %c0_i32 = arith.constant 0 : i32
    %1 = arith.cmpi eq, %c16_i32, %c0_i32 : i32
    %c1_i32 = arith.constant 1 : i32
    %2 = arith.select %1, %c1_i32, %c16_i32 : i32
    %3 = vector.broadcast %2 : i32 to vector<1x256xi32>
    %4 = arith.remsi %0, %3 : vector<1x256xi32>
    %c0_i32_0 = arith.constant 0 : i32
    %5 = vector.broadcast %c0_i32_0 : i32 to vector<1x256xi32>
    %6 = arith.cmpi ne, %4, %5 : vector<1x256xi32>
    %c0_i32_1 = arith.constant 0 : i32
    %7 = vector.broadcast %c0_i32_1 : i32 to vector<1x256xi32>
    %8 = arith.cmpi slt, %4, %7 : vector<1x256xi32>
    %c0_i32_2 = arith.constant 0 : i32
    %9 = arith.cmpi slt, %2, %c0_i32_2 : i32
    %10 = vector.broadcast %9 : i1 to vector<1x256xi1>
    %11 = vector.broadcast %10 : vector<1x256xi1> to vector<1x256xi1>
    %12 = arith.xori %8, %11 : vector<1x256xi1>
    %13 = arith.andi %12, %6 : vector<1x256xi1>
    %14 = vector.broadcast %2 : i32 to vector<1x256xi32>
    %15 = arith.addi %4, %14 : vector<1x256xi32>
    %16 = arith.select %13, %15, %4 : vector<1x256xi1>, vector<1x256xi32>
    %c16_i32_3 = arith.constant 16 : i32
    %17 = vector.broadcast %c16_i32_3 : i32 to vector<1x256xi32>
    %18 = arith.cmpi sge, %0, %17 : vector<1x256xi32>
    %c240_i32 = arith.constant 240 : i32
    %19 = vector.broadcast %c240_i32 : i32 to vector<1x256xi32>
    %20 = arith.cmpi slt, %0, %19 : vector<1x256xi32>
    %c0_i32_4 = arith.constant 0 : i32
    %21 = vector.broadcast %c0_i32_4 : i32 to vector<1x256xi32>
    %22 = arith.cmpi sgt, %16, %21 : vector<1x256xi32>
    %c15_i32 = arith.constant 15 : i32
    %23 = vector.broadcast %c15_i32 : i32 to vector<1x256xi32>
    %24 = arith.cmpi slt, %16, %23 : vector<1x256xi32>
    %25 = arith.andi %18, %22 : vector<1x256xi1>
    %26 = arith.andi %18, %24 : vector<1x256xi1>
    %27 = arith.andi %20, %22 : vector<1x256xi1>
    %28 = arith.andi %20, %24 : vector<1x256xi1>
    %c0 = arith.constant 0 : index
    %c0_5 = arith.constant 0 : index
    %c0_6 = arith.constant 0 : index
    %29 = vector.load %arg1[%c0, %c0_5, %c0_6] : memref<1x4x256xf32, #tpu.memory_space<vmem>>, vector<1x4x256xf32>
    %30 = vector.shape_cast %29 : vector<1x4x256xf32> to vector<4x256xf32>
    %c17_i32 = arith.constant 17 : i32
    %31 = tpu.dynamic_rotate %30 by %c17_i32 dim 1 : vector<4x256xf32>, i32 -> vector<4x256xf32>
    %cst = arith.constant 0.000000e+00 : f32
    %32 = vector.shape_cast %25 : vector<1x256xi1> to vector<1x256xi1>
    %33 = vector.broadcast %32 : vector<1x256xi1> to vector<4x256xi1>
    %34 = vector.broadcast %cst : f32 to vector<4x256xf32>
    %35 = arith.select %33, %31, %34 : vector<4x256xi1>, vector<4x256xf32>
    %c16_i32_7 = arith.constant 16 : i32
    %36 = tpu.dynamic_rotate %30 by %c16_i32_7 dim 1 : vector<4x256xf32>, i32 -> vector<4x256xf32>
    %cst_8 = arith.constant 0.000000e+00 : f32
    %37 = vector.shape_cast %18 : vector<1x256xi1> to vector<1x256xi1>
    %38 = vector.broadcast %37 : vector<1x256xi1> to vector<4x256xi1>
    %39 = vector.broadcast %cst_8 : f32 to vector<4x256xf32>
    %40 = arith.select %38, %36, %39 : vector<4x256xi1>, vector<4x256xf32>
    %c15_i32_9 = arith.constant 15 : i32
    %41 = tpu.dynamic_rotate %30 by %c15_i32_9 dim 1 : vector<4x256xf32>, i32 -> vector<4x256xf32>
    %cst_10 = arith.constant 0.000000e+00 : f32
    %42 = vector.shape_cast %26 : vector<1x256xi1> to vector<1x256xi1>
    %43 = vector.broadcast %42 : vector<1x256xi1> to vector<4x256xi1>
    %44 = vector.broadcast %cst_10 : f32 to vector<4x256xf32>
    %45 = arith.select %43, %41, %44 : vector<4x256xi1>, vector<4x256xf32>
    %46 = tpu.concatenate %35, %40, %45 in 0 : vector<4x256xf32>, vector<4x256xf32>, vector<4x256xf32> -> vector<12x256xf32>
    %c0_11 = arith.constant 0 : index
    %c0_12 = arith.constant 0 : index
    %c0_13 = arith.constant 0 : index
    %47 = vector.load %arg2[%c0_11, %c0_12, %c0_13] : memref<3x4x12xf32, #tpu.memory_space<vmem>>, vector<1x4x12xf32>
    %48 = vector.shape_cast %47 : vector<1x4x12xf32> to vector<4x12xf32>
    %cst_14 = arith.constant dense<0.000000e+00> : vector<4x256xf32>
    %49 = tpu.matmul %48, %46, %cst_14 {dimension_numbers = #tpu.dot_dimension_numbers<[1], [0], [0], [1], [0, 0, 1, 1], [], []>} : vector<4x12xf32>, vector<12x256xf32>, vector<4x256xf32> -> vector<4x256xf32>
    %c1_i32_15 = arith.constant 1 : i32
    %50 = tpu.dynamic_rotate %30 by %c1_i32_15 dim 1 : vector<4x256xf32>, i32 -> vector<4x256xf32>
    %cst_16 = arith.constant 0.000000e+00 : f32
    %51 = vector.shape_cast %22 : vector<1x256xi1> to vector<1x256xi1>
    %52 = vector.broadcast %51 : vector<1x256xi1> to vector<4x256xi1>
    %53 = vector.broadcast %cst_16 : f32 to vector<4x256xf32>
    %54 = arith.select %52, %50, %53 : vector<4x256xi1>, vector<4x256xf32>
    %c255_i32 = arith.constant 255 : i32
    %55 = tpu.dynamic_rotate %30 by %c255_i32 dim 1 : vector<4x256xf32>, i32 -> vector<4x256xf32>
    %cst_17 = arith.constant 0.000000e+00 : f32
    %56 = vector.shape_cast %24 : vector<1x256xi1> to vector<1x256xi1>
    %57 = vector.broadcast %56 : vector<1x256xi1> to vector<4x256xi1>
    %58 = vector.broadcast %cst_17 : f32 to vector<4x256xf32>
    %59 = arith.select %57, %55, %58 : vector<4x256xi1>, vector<4x256xf32>
    %60 = tpu.concatenate %54, %30, %59 in 0 : vector<4x256xf32>, vector<4x256xf32>, vector<4x256xf32> -> vector<12x256xf32>
    %c1 = arith.constant 1 : index
    %c0_18 = arith.constant 0 : index
    %c0_19 = arith.constant 0 : index
    %61 = vector.load %arg2[%c1, %c0_18, %c0_19] : memref<3x4x12xf32, #tpu.memory_space<vmem>>, vector<1x4x12xf32>
    %62 = vector.shape_cast %61 : vector<1x4x12xf32> to vector<4x12xf32>
    %cst_20 = arith.constant dense<0.000000e+00> : vector<4x256xf32>
    %63 = tpu.matmul %62, %60, %cst_20 {dimension_numbers = #tpu.dot_dimension_numbers<[1], [0], [0], [1], [0, 0, 1, 1], [], []>} : vector<4x12xf32>, vector<12x256xf32>, vector<4x256xf32> -> vector<4x256xf32>
    %64 = arith.addf %49, %63 : vector<4x256xf32>
    %c241_i32 = arith.constant 241 : i32
    %65 = tpu.dynamic_rotate %30 by %c241_i32 dim 1 : vector<4x256xf32>, i32 -> vector<4x256xf32>
    %cst_21 = arith.constant 0.000000e+00 : f32
    %66 = vector.shape_cast %27 : vector<1x256xi1> to vector<1x256xi1>
    %67 = vector.broadcast %66 : vector<1x256xi1> to vector<4x256xi1>
    %68 = vector.broadcast %cst_21 : f32 to vector<4x256xf32>
    %69 = arith.select %67, %65, %68 : vector<4x256xi1>, vector<4x256xf32>
    %c240_i32_22 = arith.constant 240 : i32
    %70 = tpu.dynamic_rotate %30 by %c240_i32_22 dim 1 : vector<4x256xf32>, i32 -> vector<4x256xf32>
    %cst_23 = arith.constant 0.000000e+00 : f32
    %71 = vector.shape_cast %20 : vector<1x256xi1> to vector<1x256xi1>
    %72 = vector.broadcast %71 : vector<1x256xi1> to vector<4x256xi1>
    %73 = vector.broadcast %cst_23 : f32 to vector<4x256xf32>
    %74 = arith.select %72, %70, %73 : vector<4x256xi1>, vector<4x256xf32>
    %c239_i32 = arith.constant 239 : i32
    %75 = tpu.dynamic_rotate %30 by %c239_i32 dim 1 : vector<4x256xf32>, i32 -> vector<4x256xf32>
    %cst_24 = arith.constant 0.000000e+00 : f32
    %76 = vector.shape_cast %28 : vector<1x256xi1> to vector<1x256xi1>
    %77 = vector.broadcast %76 : vector<1x256xi1> to vector<4x256xi1>
    %78 = vector.broadcast %cst_24 : f32 to vector<4x256xf32>
    %79 = arith.select %77, %75, %78 : vector<4x256xi1>, vector<4x256xf32>
    %80 = tpu.concatenate %69, %74, %79 in 0 : vector<4x256xf32>, vector<4x256xf32>, vector<4x256xf32> -> vector<12x256xf32>
    %c2 = arith.constant 2 : index
    %c0_25 = arith.constant 0 : index
    %c0_26 = arith.constant 0 : index
    %81 = vector.load %arg2[%c2, %c0_25, %c0_26] : memref<3x4x12xf32, #tpu.memory_space<vmem>>, vector<1x4x12xf32>
    %82 = vector.shape_cast %81 : vector<1x4x12xf32> to vector<4x12xf32>
    %cst_27 = arith.constant dense<0.000000e+00> : vector<4x256xf32>
    %83 = tpu.matmul %82, %80, %cst_27 {dimension_numbers = #tpu.dot_dimension_numbers<[1], [0], [0], [1], [0, 0, 1, 1], [], []>} : vector<4x12xf32>, vector<12x256xf32>, vector<4x256xf32> -> vector<4x256xf32>
    %84 = arith.addf %64, %83 : vector<4x256xf32>
    %cst_28 = arith.constant dense<0.000000e+00> : vector<4xf32>
    %85 = vector.multi_reduction <add>, %84, %cst_28 [1] : vector<4x256xf32> to vector<4xf32>
    %86 = vector.shape_cast %85 : vector<4xf32> to vector<4x1xf32>
    %87 = arith.mulf %84, %84 : vector<4x256xf32>
    %cst_29 = arith.constant dense<0.000000e+00> : vector<4xf32>
    %88 = vector.multi_reduction <add>, %87, %cst_29 [1] : vector<4x256xf32> to vector<4xf32>
    %89 = vector.shape_cast %88 : vector<4xf32> to vector<4x1xf32>
    %cst_30 = arith.constant 3.906250e-03 : f32
    %90 = vector.broadcast %cst_30 : f32 to vector<4x1xf32>
    %91 = arith.mulf %86, %90 : vector<4x1xf32>
    %cst_31 = arith.constant 3.906250e-03 : f32
    %92 = vector.broadcast %cst_31 : f32 to vector<4x1xf32>
    %93 = arith.mulf %89, %92 : vector<4x1xf32>
    %94 = arith.mulf %91, %91 : vector<4x1xf32>
    %95 = arith.subf %93, %94 : vector<4x1xf32>
    %cst_32 = arith.constant 0.000000e+00 : f32
    %96 = vector.broadcast %cst_32 : f32 to vector<4x1xf32>
    %97 = arith.maximumf %95, %96 : vector<4x1xf32>
    %98 = vector.broadcast %91 : vector<4x1xf32> to vector<4x256xf32>
    %99 = arith.subf %84, %98 : vector<4x256xf32>
    %cst_33 = arith.constant 9.99999974E-6 : f32
    %100 = vector.broadcast %cst_33 : f32 to vector<4x1xf32>
    %101 = arith.addf %97, %100 : vector<4x1xf32>
    %102 = math.rsqrt %101 : vector<4x1xf32>
    %103 = vector.broadcast %102 : vector<4x1xf32> to vector<4x256xf32>
    %104 = arith.mulf %99, %103 : vector<4x256xf32>
    %cst_34 = arith.constant 0.000000e+00 : f32
    %105 = vector.broadcast %cst_34 : f32 to vector<4x256xf32>
    %106 = arith.maximumf %104, %105 : vector<4x256xf32>
    %c17_i32_35 = arith.constant 17 : i32
    %107 = tpu.dynamic_rotate %106 by %c17_i32_35 dim 1 : vector<4x256xf32>, i32 -> vector<4x256xf32>
    %cst_36 = arith.constant 0.000000e+00 : f32
    %108 = vector.shape_cast %25 : vector<1x256xi1> to vector<1x256xi1>
    %109 = vector.broadcast %108 : vector<1x256xi1> to vector<4x256xi1>
    %110 = vector.broadcast %cst_36 : f32 to vector<4x256xf32>
    %111 = arith.select %109, %107, %110 : vector<4x256xi1>, vector<4x256xf32>
    %c16_i32_37 = arith.constant 16 : i32
    %112 = tpu.dynamic_rotate %106 by %c16_i32_37 dim 1 : vector<4x256xf32>, i32 -> vector<4x256xf32>
    %cst_38 = arith.constant 0.000000e+00 : f32
    %113 = vector.shape_cast %18 : vector<1x256xi1> to vector<1x256xi1>
    %114 = vector.broadcast %113 : vector<1x256xi1> to vector<4x256xi1>
    %115 = vector.broadcast %cst_38 : f32 to vector<4x256xf32>
    %116 = arith.select %114, %112, %115 : vector<4x256xi1>, vector<4x256xf32>
    %c15_i32_39 = arith.constant 15 : i32
    %117 = tpu.dynamic_rotate %106 by %c15_i32_39 dim 1 : vector<4x256xf32>, i32 -> vector<4x256xf32>
    %cst_40 = arith.constant 0.000000e+00 : f32
    %118 = vector.shape_cast %26 : vector<1x256xi1> to vector<1x256xi1>
    %119 = vector.broadcast %118 : vector<1x256xi1> to vector<4x256xi1>
    %120 = vector.broadcast %cst_40 : f32 to vector<4x256xf32>
    %121 = arith.select %119, %117, %120 : vector<4x256xi1>, vector<4x256xf32>
    %122 = tpu.concatenate %111, %116, %121 in 0 : vector<4x256xf32>, vector<4x256xf32>, vector<4x256xf32> -> vector<12x256xf32>
    %c0_41 = arith.constant 0 : index
    %c0_42 = arith.constant 0 : index
    %c0_43 = arith.constant 0 : index
    %123 = vector.load %arg3[%c0_41, %c0_42, %c0_43] : memref<3x4x12xf32, #tpu.memory_space<vmem>>, vector<1x4x12xf32>
    %124 = vector.shape_cast %123 : vector<1x4x12xf32> to vector<4x12xf32>
    %cst_44 = arith.constant dense<0.000000e+00> : vector<4x256xf32>
    %125 = tpu.matmul %124, %122, %cst_44 {dimension_numbers = #tpu.dot_dimension_numbers<[1], [0], [0], [1], [0, 0, 1, 1], [], []>} : vector<4x12xf32>, vector<12x256xf32>, vector<4x256xf32> -> vector<4x256xf32>
    %c1_i32_45 = arith.constant 1 : i32
    %126 = tpu.dynamic_rotate %106 by %c1_i32_45 dim 1 : vector<4x256xf32>, i32 -> vector<4x256xf32>
    %cst_46 = arith.constant 0.000000e+00 : f32
    %127 = vector.shape_cast %22 : vector<1x256xi1> to vector<1x256xi1>
    %128 = vector.broadcast %127 : vector<1x256xi1> to vector<4x256xi1>
    %129 = vector.broadcast %cst_46 : f32 to vector<4x256xf32>
    %130 = arith.select %128, %126, %129 : vector<4x256xi1>, vector<4x256xf32>
    %c255_i32_47 = arith.constant 255 : i32
    %131 = tpu.dynamic_rotate %106 by %c255_i32_47 dim 1 : vector<4x256xf32>, i32 -> vector<4x256xf32>
    %cst_48 = arith.constant 0.000000e+00 : f32
    %132 = vector.shape_cast %24 : vector<1x256xi1> to vector<1x256xi1>
    %133 = vector.broadcast %132 : vector<1x256xi1> to vector<4x256xi1>
    %134 = vector.broadcast %cst_48 : f32 to vector<4x256xf32>
    %135 = arith.select %133, %131, %134 : vector<4x256xi1>, vector<4x256xf32>
    %136 = tpu.concatenate %130, %106, %135 in 0 : vector<4x256xf32>, vector<4x256xf32>, vector<4x256xf32> -> vector<12x256xf32>
    %c1_49 = arith.constant 1 : index
    %c0_50 = arith.constant 0 : index
    %c0_51 = arith.constant 0 : index
    %137 = vector.load %arg3[%c1_49, %c0_50, %c0_51] : memref<3x4x12xf32, #tpu.memory_space<vmem>>, vector<1x4x12xf32>
    %138 = vector.shape_cast %137 : vector<1x4x12xf32> to vector<4x12xf32>
    %cst_52 = arith.constant dense<0.000000e+00> : vector<4x256xf32>
    %139 = tpu.matmul %138, %136, %cst_52 {dimension_numbers = #tpu.dot_dimension_numbers<[1], [0], [0], [1], [0, 0, 1, 1], [], []>} : vector<4x12xf32>, vector<12x256xf32>, vector<4x256xf32> -> vector<4x256xf32>
    %140 = arith.addf %125, %139 : vector<4x256xf32>
    %c241_i32_53 = arith.constant 241 : i32
    %141 = tpu.dynamic_rotate %106 by %c241_i32_53 dim 1 : vector<4x256xf32>, i32 -> vector<4x256xf32>
    %cst_54 = arith.constant 0.000000e+00 : f32
    %142 = vector.shape_cast %27 : vector<1x256xi1> to vector<1x256xi1>
    %143 = vector.broadcast %142 : vector<1x256xi1> to vector<4x256xi1>
    %144 = vector.broadcast %cst_54 : f32 to vector<4x256xf32>
    %145 = arith.select %143, %141, %144 : vector<4x256xi1>, vector<4x256xf32>
    %c240_i32_55 = arith.constant 240 : i32
    %146 = tpu.dynamic_rotate %106 by %c240_i32_55 dim 1 : vector<4x256xf32>, i32 -> vector<4x256xf32>
    %cst_56 = arith.constant 0.000000e+00 : f32
    %147 = vector.shape_cast %20 : vector<1x256xi1> to vector<1x256xi1>
    %148 = vector.broadcast %147 : vector<1x256xi1> to vector<4x256xi1>
    %149 = vector.broadcast %cst_56 : f32 to vector<4x256xf32>
    %150 = arith.select %148, %146, %149 : vector<4x256xi1>, vector<4x256xf32>
    %c239_i32_57 = arith.constant 239 : i32
    %151 = tpu.dynamic_rotate %106 by %c239_i32_57 dim 1 : vector<4x256xf32>, i32 -> vector<4x256xf32>
    %cst_58 = arith.constant 0.000000e+00 : f32
    %152 = vector.shape_cast %28 : vector<1x256xi1> to vector<1x256xi1>
    %153 = vector.broadcast %152 : vector<1x256xi1> to vector<4x256xi1>
    %154 = vector.broadcast %cst_58 : f32 to vector<4x256xf32>
    %155 = arith.select %153, %151, %154 : vector<4x256xi1>, vector<4x256xf32>
    %156 = tpu.concatenate %145, %150, %155 in 0 : vector<4x256xf32>, vector<4x256xf32>, vector<4x256xf32> -> vector<12x256xf32>
    %c2_59 = arith.constant 2 : index
    %c0_60 = arith.constant 0 : index
    %c0_61 = arith.constant 0 : index
    %157 = vector.load %arg3[%c2_59, %c0_60, %c0_61] : memref<3x4x12xf32, #tpu.memory_space<vmem>>, vector<1x4x12xf32>
    %158 = vector.shape_cast %157 : vector<1x4x12xf32> to vector<4x12xf32>
    %cst_62 = arith.constant dense<0.000000e+00> : vector<4x256xf32>
    %159 = tpu.matmul %158, %156, %cst_62 {dimension_numbers = #tpu.dot_dimension_numbers<[1], [0], [0], [1], [0, 0, 1, 1], [], []>} : vector<4x12xf32>, vector<12x256xf32>, vector<4x256xf32> -> vector<4x256xf32>
    %160 = arith.addf %140, %159 : vector<4x256xf32>
    %cst_63 = arith.constant dense<0.000000e+00> : vector<4xf32>
    %161 = vector.multi_reduction <add>, %160, %cst_63 [1] : vector<4x256xf32> to vector<4xf32>
    %162 = vector.shape_cast %161 : vector<4xf32> to vector<4x1xf32>
    %163 = arith.mulf %160, %160 : vector<4x256xf32>
    %cst_64 = arith.constant dense<0.000000e+00> : vector<4xf32>
    %164 = vector.multi_reduction <add>, %163, %cst_64 [1] : vector<4x256xf32> to vector<4xf32>
    %165 = vector.shape_cast %164 : vector<4xf32> to vector<4x1xf32>
    %cst_65 = arith.constant 3.906250e-03 : f32
    %166 = vector.broadcast %cst_65 : f32 to vector<4x1xf32>
    %167 = arith.mulf %162, %166 : vector<4x1xf32>
    %cst_66 = arith.constant 3.906250e-03 : f32
    %168 = vector.broadcast %cst_66 : f32 to vector<4x1xf32>
    %169 = arith.mulf %165, %168 : vector<4x1xf32>
    %170 = arith.mulf %167, %167 : vector<4x1xf32>
    %171 = arith.subf %169, %170 : vector<4x1xf32>
    %cst_67 = arith.constant 0.000000e+00 : f32
    %172 = vector.broadcast %cst_67 : f32 to vector<4x1xf32>
    %173 = arith.maximumf %171, %172 : vector<4x1xf32>
    %174 = vector.broadcast %167 : vector<4x1xf32> to vector<4x256xf32>
    %175 = arith.subf %160, %174 : vector<4x256xf32>
    %cst_68 = arith.constant 9.99999974E-6 : f32
    %176 = vector.broadcast %cst_68 : f32 to vector<4x1xf32>
    %177 = arith.addf %173, %176 : vector<4x1xf32>
    %178 = math.rsqrt %177 : vector<4x1xf32>
    %179 = vector.broadcast %178 : vector<4x1xf32> to vector<4x256xf32>
    %180 = arith.mulf %175, %179 : vector<4x256xf32>
    %181 = arith.addf %30, %180 : vector<4x256xf32>
    %c0_69 = arith.constant 0 : index
    %c0_70 = arith.constant 0 : index
    %c0_71 = arith.constant 0 : index
    %182 = vector.load %arg4[%c0_69, %c0_70, %c0_71] : memref<1x4x256xf32, #tpu.memory_space<vmem>>, vector<1x4x256xf32>
    %183 = vector.shape_cast %182 : vector<1x4x256xf32> to vector<4x256xf32>
    %184 = vector.shape_cast %181 : vector<4x256xf32> to vector<1x4x256xf32>
    tpu.vector_store %arg4[%c0_69, %c0_70, %c0_71], %184 {strides = array<i32>} : memref<1x4x256xf32, #tpu.memory_space<vmem>>, vector<1x4x256xf32>,
    return
  }
  func.func @transform_0(%arg0: i32) -> (i32, i32, i32) {
    %c0_i32 = arith.constant 0 : i32
    %c0_i32_0 = arith.constant 0 : i32
    %c0_i32_1 = arith.constant 0 : i32
    return %arg0, %c0_i32, %c0_i32_0 : i32, i32, i32
  }
  func.func @transform_1(%arg0: i32) -> (i32, i32, i32) {
    %c0_i32 = arith.constant 0 : i32
    %c0_i32_0 = arith.constant 0 : i32
    %c0_i32_1 = arith.constant 0 : i32
    %c0_i32_2 = arith.constant 0 : i32
    return %c0_i32, %c0_i32_0, %c0_i32_1 : i32, i32, i32
  }
  func.func @transform_2(%arg0: i32) -> (i32, i32, i32) {
    %c0_i32 = arith.constant 0 : i32
    %c0_i32_0 = arith.constant 0 : i32
    %c0_i32_1 = arith.constant 0 : i32
    %c0_i32_2 = arith.constant 0 : i32
    return %c0_i32, %c0_i32_0, %c0_i32_1 : i32, i32, i32
  }
  func.func @transform_3(%arg0: i32) -> (i32, i32, i32) {
    %c0_i32 = arith.constant 0 : i32
    %c0_i32_0 = arith.constant 0 : i32
    %c0_i32_1 = arith.constant 0 : i32
    return %arg0, %c0_i32, %c0_i32_0 : i32, i32, i32
  }
}

module attributes {stable_mosaic.version = 11 : i64} {
  func.func @kernel(%arg0: i32, %arg1: memref<1x4x256xf32, #tpu.memory_space<vmem>>, %arg2: memref<3x4x12xf32, #tpu.memory_space<vmem>>, %arg3: memref<3x4x12xf32, #tpu.memory_space<vmem>>, %arg4: memref<1x4x256xf32, #tpu.memory_space<vmem>>) attributes {dimension_semantics = [#tpu.dimension_semantics<parallel>], iteration_bounds = array<i64: 2>, scalar_prefetch = 0 : i64, scratch_operands = 0 : i64, tpu.core_type = #tpu.core_type<tc>, window_params = [{transform_indices = @transform_0, window_bounds = array<i64: 1, 4, 256>}, {pipeline_mode = #tpu.pipeline_mode<synchronous>, transform_indices = @transform_1, window_bounds = array<i64: 3, 4, 12>}, {pipeline_mode = #tpu.pipeline_mode<synchronous>, transform_indices = @transform_2, window_bounds = array<i64: 3, 4, 12>}, {transform_indices = @transform_3, window_bounds = array<i64: 1, 4, 256>}]} {
    %0 = tpu.iota {dimensions = array<i32: 1>} : vector<1x256xi32>
    %c16_i32 = arith.constant 16 : i32
    %c0_i32 = arith.constant 0 : i32
    %1 = arith.cmpi eq, %c16_i32, %c0_i32 : i32
    %c1_i32 = arith.constant 1 : i32
    %2 = arith.select %1, %c1_i32, %c16_i32 : i32
    %3 = vector.broadcast %2 : i32 to vector<1x256xi32>
    %4 = arith.remsi %0, %3 : vector<1x256xi32>
    %c0_i32_0 = arith.constant 0 : i32
    %5 = vector.broadcast %c0_i32_0 : i32 to vector<1x256xi32>
    %6 = arith.cmpi ne, %4, %5 : vector<1x256xi32>
    %c0_i32_1 = arith.constant 0 : i32
    %7 = vector.broadcast %c0_i32_1 : i32 to vector<1x256xi32>
    %8 = arith.cmpi slt, %4, %7 : vector<1x256xi32>
    %c0_i32_2 = arith.constant 0 : i32
    %9 = arith.cmpi slt, %2, %c0_i32_2 : i32
    %10 = vector.broadcast %9 : i1 to vector<1x256xi1>
    %11 = vector.broadcast %10 : vector<1x256xi1> to vector<1x256xi1>
    %12 = arith.xori %8, %11 : vector<1x256xi1>
    %13 = arith.andi %12, %6 : vector<1x256xi1>
    %14 = vector.broadcast %2 : i32 to vector<1x256xi32>
    %15 = arith.addi %4, %14 : vector<1x256xi32>
    %16 = arith.select %13, %15, %4 : vector<1x256xi1>, vector<1x256xi32>
    %c16_i32_3 = arith.constant 16 : i32
    %17 = vector.broadcast %c16_i32_3 : i32 to vector<1x256xi32>
    %18 = arith.cmpi sge, %0, %17 : vector<1x256xi32>
    %c240_i32 = arith.constant 240 : i32
    %19 = vector.broadcast %c240_i32 : i32 to vector<1x256xi32>
    %20 = arith.cmpi slt, %0, %19 : vector<1x256xi32>
    %c0_i32_4 = arith.constant 0 : i32
    %21 = vector.broadcast %c0_i32_4 : i32 to vector<1x256xi32>
    %22 = arith.cmpi sgt, %16, %21 : vector<1x256xi32>
    %c15_i32 = arith.constant 15 : i32
    %23 = vector.broadcast %c15_i32 : i32 to vector<1x256xi32>
    %24 = arith.cmpi slt, %16, %23 : vector<1x256xi32>
    %25 = arith.andi %18, %22 : vector<1x256xi1>
    %26 = arith.andi %18, %24 : vector<1x256xi1>
    %27 = arith.andi %20, %22 : vector<1x256xi1>
    %28 = arith.andi %20, %24 : vector<1x256xi1>
    %c0 = arith.constant 0 : index
    %c0_5 = arith.constant 0 : index
    %c0_6 = arith.constant 0 : index
    %29 = vector.load %arg1[%c0, %c0_5, %c0_6] : memref<1x4x256xf32, #tpu.memory_space<vmem>>, vector<1x4x256xf32>
    %30 = vector.shape_cast %29 : vector<1x4x256xf32> to vector<4x256xf32>
    %c17_i32 = arith.constant 17 : i32
    %31 = tpu.dynamic_rotate %30 by %c17_i32 dim 1 : vector<4x256xf32>, i32 -> vector<4x256xf32>
    %cst = arith.constant 0.000000e+00 : f32
    %32 = vector.shape_cast %25 : vector<1x256xi1> to vector<1x256xi1>
    %33 = vector.broadcast %32 : vector<1x256xi1> to vector<4x256xi1>
    %34 = vector.broadcast %cst : f32 to vector<4x256xf32>
    %35 = arith.select %33, %31, %34 : vector<4x256xi1>, vector<4x256xf32>
    %c16_i32_7 = arith.constant 16 : i32
    %36 = tpu.dynamic_rotate %30 by %c16_i32_7 dim 1 : vector<4x256xf32>, i32 -> vector<4x256xf32>
    %cst_8 = arith.constant 0.000000e+00 : f32
    %37 = vector.shape_cast %18 : vector<1x256xi1> to vector<1x256xi1>
    %38 = vector.broadcast %37 : vector<1x256xi1> to vector<4x256xi1>
    %39 = vector.broadcast %cst_8 : f32 to vector<4x256xf32>
    %40 = arith.select %38, %36, %39 : vector<4x256xi1>, vector<4x256xf32>
    %c15_i32_9 = arith.constant 15 : i32
    %41 = tpu.dynamic_rotate %30 by %c15_i32_9 dim 1 : vector<4x256xf32>, i32 -> vector<4x256xf32>
    %cst_10 = arith.constant 0.000000e+00 : f32
    %42 = vector.shape_cast %26 : vector<1x256xi1> to vector<1x256xi1>
    %43 = vector.broadcast %42 : vector<1x256xi1> to vector<4x256xi1>
    %44 = vector.broadcast %cst_10 : f32 to vector<4x256xf32>
    %45 = arith.select %43, %41, %44 : vector<4x256xi1>, vector<4x256xf32>
    %46 = tpu.concatenate %35, %40, %45 in 0 : vector<4x256xf32>, vector<4x256xf32>, vector<4x256xf32> -> vector<12x256xf32>
    %c0_11 = arith.constant 0 : index
    %c0_12 = arith.constant 0 : index
    %c0_13 = arith.constant 0 : index
    %47 = vector.load %arg2[%c0_11, %c0_12, %c0_13] : memref<3x4x12xf32, #tpu.memory_space<vmem>>, vector<1x4x12xf32>
    %48 = vector.shape_cast %47 : vector<1x4x12xf32> to vector<4x12xf32>
    %cst_14 = arith.constant dense<0.000000e+00> : vector<4x256xf32>
    %49 = tpu.matmul %48, %46, %cst_14 {dimension_numbers = #tpu.dot_dimension_numbers<[1], [0], [0], [1], [0, 0, 1, 1], [], []>} : vector<4x12xf32>, vector<12x256xf32>, vector<4x256xf32> -> vector<4x256xf32>
    %c1_i32_15 = arith.constant 1 : i32
    %50 = tpu.dynamic_rotate %30 by %c1_i32_15 dim 1 : vector<4x256xf32>, i32 -> vector<4x256xf32>
    %cst_16 = arith.constant 0.000000e+00 : f32
    %51 = vector.shape_cast %22 : vector<1x256xi1> to vector<1x256xi1>
    %52 = vector.broadcast %51 : vector<1x256xi1> to vector<4x256xi1>
    %53 = vector.broadcast %cst_16 : f32 to vector<4x256xf32>
    %54 = arith.select %52, %50, %53 : vector<4x256xi1>, vector<4x256xf32>
    %c255_i32 = arith.constant 255 : i32
    %55 = tpu.dynamic_rotate %30 by %c255_i32 dim 1 : vector<4x256xf32>, i32 -> vector<4x256xf32>
    %cst_17 = arith.constant 0.000000e+00 : f32
    %56 = vector.shape_cast %24 : vector<1x256xi1> to vector<1x256xi1>
    %57 = vector.broadcast %56 : vector<1x256xi1> to vector<4x256xi1>
    %58 = vector.broadcast %cst_17 : f32 to vector<4x256xf32>
    %59 = arith.select %57, %55, %58 : vector<4x256xi1>, vector<4x256xf32>
    %60 = tpu.concatenate %54, %30, %59 in 0 : vector<4x256xf32>, vector<4x256xf32>, vector<4x256xf32> -> vector<12x256xf32>
    %c1 = arith.constant 1 : index
    %c0_18 = arith.constant 0 : index
    %c0_19 = arith.constant 0 : index
    %61 = vector.load %arg2[%c1, %c0_18, %c0_19] : memref<3x4x12xf32, #tpu.memory_space<vmem>>, vector<1x4x12xf32>
    %62 = vector.shape_cast %61 : vector<1x4x12xf32> to vector<4x12xf32>
    %cst_20 = arith.constant dense<0.000000e+00> : vector<4x256xf32>
    %63 = tpu.matmul %62, %60, %cst_20 {dimension_numbers = #tpu.dot_dimension_numbers<[1], [0], [0], [1], [0, 0, 1, 1], [], []>} : vector<4x12xf32>, vector<12x256xf32>, vector<4x256xf32> -> vector<4x256xf32>
    %64 = arith.addf %49, %63 : vector<4x256xf32>
    %c241_i32 = arith.constant 241 : i32
    %65 = tpu.dynamic_rotate %30 by %c241_i32 dim 1 : vector<4x256xf32>, i32 -> vector<4x256xf32>
    %cst_21 = arith.constant 0.000000e+00 : f32
    %66 = vector.shape_cast %27 : vector<1x256xi1> to vector<1x256xi1>
    %67 = vector.broadcast %66 : vector<1x256xi1> to vector<4x256xi1>
    %68 = vector.broadcast %cst_21 : f32 to vector<4x256xf32>
    %69 = arith.select %67, %65, %68 : vector<4x256xi1>, vector<4x256xf32>
    %c240_i32_22 = arith.constant 240 : i32
    %70 = tpu.dynamic_rotate %30 by %c240_i32_22 dim 1 : vector<4x256xf32>, i32 -> vector<4x256xf32>
    %cst_23 = arith.constant 0.000000e+00 : f32
    %71 = vector.shape_cast %20 : vector<1x256xi1> to vector<1x256xi1>
    %72 = vector.broadcast %71 : vector<1x256xi1> to vector<4x256xi1>
    %73 = vector.broadcast %cst_23 : f32 to vector<4x256xf32>
    %74 = arith.select %72, %70, %73 : vector<4x256xi1>, vector<4x256xf32>
    %c239_i32 = arith.constant 239 : i32
    %75 = tpu.dynamic_rotate %30 by %c239_i32 dim 1 : vector<4x256xf32>, i32 -> vector<4x256xf32>
    %cst_24 = arith.constant 0.000000e+00 : f32
    %76 = vector.shape_cast %28 : vector<1x256xi1> to vector<1x256xi1>
    %77 = vector.broadcast %76 : vector<1x256xi1> to vector<4x256xi1>
    %78 = vector.broadcast %cst_24 : f32 to vector<4x256xf32>
    %79 = arith.select %77, %75, %78 : vector<4x256xi1>, vector<4x256xf32>
    %80 = tpu.concatenate %69, %74, %79 in 0 : vector<4x256xf32>, vector<4x256xf32>, vector<4x256xf32> -> vector<12x256xf32>
    %c2 = arith.constant 2 : index
    %c0_25 = arith.constant 0 : index
    %c0_26 = arith.constant 0 : index
    %81 = vector.load %arg2[%c2, %c0_25, %c0_26] : memref<3x4x12xf32, #tpu.memory_space<vmem>>, vector<1x4x12xf32>
    %82 = vector.shape_cast %81 : vector<1x4x12xf32> to vector<4x12xf32>
    %cst_27 = arith.constant dense<0.000000e+00> : vector<4x256xf32>
    %83 = tpu.matmul %82, %80, %cst_27 {dimension_numbers = #tpu.dot_dimension_numbers<[1], [0], [0], [1], [0, 0, 1, 1], [], []>} : vector<4x12xf32>, vector<12x256xf32>, vector<4x256xf32> -> vector<4x256xf32>
    %84 = arith.addf %64, %83 : vector<4x256xf32>
    %cst_28 = arith.constant dense<0.000000e+00> : vector<4xf32>
    %85 = vector.multi_reduction <add>, %84, %cst_28 [1] : vector<4x256xf32> to vector<4xf32>
    %86 = vector.shape_cast %85 : vector<4xf32> to vector<4x1xf32>
    %87 = arith.mulf %84, %84 : vector<4x256xf32>
    %cst_29 = arith.constant dense<0.000000e+00> : vector<4xf32>
    %88 = vector.multi_reduction <add>, %87, %cst_29 [1] : vector<4x256xf32> to vector<4xf32>
    %89 = vector.shape_cast %88 : vector<4xf32> to vector<4x1xf32>
    %cst_30 = arith.constant 3.906250e-03 : f32
    %90 = vector.broadcast %cst_30 : f32 to vector<4x1xf32>
    %91 = arith.mulf %86, %90 : vector<4x1xf32>
    %cst_31 = arith.constant 3.906250e-03 : f32
    %92 = vector.broadcast %cst_31 : f32 to vector<4x1xf32>
    %93 = arith.mulf %89, %92 : vector<4x1xf32>
    %94 = arith.mulf %91, %91 : vector<4x1xf32>
    %95 = arith.subf %93, %94 : vector<4x1xf32>
    %cst_32 = arith.constant 0.000000e+00 : f32
    %96 = vector.broadcast %cst_32 : f32 to vector<4x1xf32>
    %97 = arith.maximumf %95, %96 : vector<4x1xf32>
    %98 = vector.broadcast %91 : vector<4x1xf32> to vector<4x256xf32>
    %99 = arith.subf %84, %98 : vector<4x256xf32>
    %cst_33 = arith.constant 9.99999974E-6 : f32
    %100 = vector.broadcast %cst_33 : f32 to vector<4x1xf32>
    %101 = arith.addf %97, %100 : vector<4x1xf32>
    %102 = math.rsqrt %101 : vector<4x1xf32>
    %103 = vector.broadcast %102 : vector<4x1xf32> to vector<4x256xf32>
    %104 = arith.mulf %99, %103 : vector<4x256xf32>
    %cst_34 = arith.constant 0.000000e+00 : f32
    %105 = vector.broadcast %cst_34 : f32 to vector<4x256xf32>
    %106 = arith.maximumf %104, %105 : vector<4x256xf32>
    %c17_i32_35 = arith.constant 17 : i32
    %107 = tpu.dynamic_rotate %106 by %c17_i32_35 dim 1 : vector<4x256xf32>, i32 -> vector<4x256xf32>
    %cst_36 = arith.constant 0.000000e+00 : f32
    %108 = vector.shape_cast %25 : vector<1x256xi1> to vector<1x256xi1>
    %109 = vector.broadcast %108 : vector<1x256xi1> to vector<4x256xi1>
    %110 = vector.broadcast %cst_36 : f32 to vector<4x256xf32>
    %111 = arith.select %109, %107, %110 : vector<4x256xi1>, vector<4x256xf32>
    %c16_i32_37 = arith.constant 16 : i32
    %112 = tpu.dynamic_rotate %106 by %c16_i32_37 dim 1 : vector<4x256xf32>, i32 -> vector<4x256xf32>
    %cst_38 = arith.constant 0.000000e+00 : f32
    %113 = vector.shape_cast %18 : vector<1x256xi1> to vector<1x256xi1>
    %114 = vector.broadcast %113 : vector<1x256xi1> to vector<4x256xi1>
    %115 = vector.broadcast %cst_38 : f32 to vector<4x256xf32>
    %116 = arith.select %114, %112, %115 : vector<4x256xi1>, vector<4x256xf32>
    %c15_i32_39 = arith.constant 15 : i32
    %117 = tpu.dynamic_rotate %106 by %c15_i32_39 dim 1 : vector<4x256xf32>, i32 -> vector<4x256xf32>
    %cst_40 = arith.constant 0.000000e+00 : f32
    %118 = vector.shape_cast %26 : vector<1x256xi1> to vector<1x256xi1>
    %119 = vector.broadcast %118 : vector<1x256xi1> to vector<4x256xi1>
    %120 = vector.broadcast %cst_40 : f32 to vector<4x256xf32>
    %121 = arith.select %119, %117, %120 : vector<4x256xi1>, vector<4x256xf32>
    %122 = tpu.concatenate %111, %116, %121 in 0 : vector<4x256xf32>, vector<4x256xf32>, vector<4x256xf32> -> vector<12x256xf32>
    %c0_41 = arith.constant 0 : index
    %c0_42 = arith.constant 0 : index
    %c0_43 = arith.constant 0 : index
    %123 = vector.load %arg3[%c0_41, %c0_42, %c0_43] : memref<3x4x12xf32, #tpu.memory_space<vmem>>, vector<1x4x12xf32>
    %124 = vector.shape_cast %123 : vector<1x4x12xf32> to vector<4x12xf32>
    %cst_44 = arith.constant dense<0.000000e+00> : vector<4x256xf32>
    %125 = tpu.matmul %124, %122, %cst_44 {dimension_numbers = #tpu.dot_dimension_numbers<[1], [0], [0], [1], [0, 0, 1, 1], [], []>} : vector<4x12xf32>, vector<12x256xf32>, vector<4x256xf32> -> vector<4x256xf32>
    %c1_i32_45 = arith.constant 1 : i32
    %126 = tpu.dynamic_rotate %106 by %c1_i32_45 dim 1 : vector<4x256xf32>, i32 -> vector<4x256xf32>
    %cst_46 = arith.constant 0.000000e+00 : f32
    %127 = vector.shape_cast %22 : vector<1x256xi1> to vector<1x256xi1>
    %128 = vector.broadcast %127 : vector<1x256xi1> to vector<4x256xi1>
    %129 = vector.broadcast %cst_46 : f32 to vector<4x256xf32>
    %130 = arith.select %128, %126, %129 : vector<4x256xi1>, vector<4x256xf32>
    %c255_i32_47 = arith.constant 255 : i32
    %131 = tpu.dynamic_rotate %106 by %c255_i32_47 dim 1 : vector<4x256xf32>, i32 -> vector<4x256xf32>
    %cst_48 = arith.constant 0.000000e+00 : f32
    %132 = vector.shape_cast %24 : vector<1x256xi1> to vector<1x256xi1>
    %133 = vector.broadcast %132 : vector<1x256xi1> to vector<4x256xi1>
    %134 = vector.broadcast %cst_48 : f32 to vector<4x256xf32>
    %135 = arith.select %133, %131, %134 : vector<4x256xi1>, vector<4x256xf32>
    %136 = tpu.concatenate %130, %106, %135 in 0 : vector<4x256xf32>, vector<4x256xf32>, vector<4x256xf32> -> vector<12x256xf32>
    %c1_49 = arith.constant 1 : index
    %c0_50 = arith.constant 0 : index
    %c0_51 = arith.constant 0 : index
    %137 = vector.load %arg3[%c1_49, %c0_50, %c0_51] : memref<3x4x12xf32, #tpu.memory_space<vmem>>, vector<1x4x12xf32>
    %138 = vector.shape_cast %137 : vector<1x4x12xf32> to vector<4x12xf32>
    %cst_52 = arith.constant dense<0.000000e+00> : vector<4x256xf32>
    %139 = tpu.matmul %138, %136, %cst_52 {dimension_numbers = #tpu.dot_dimension_numbers<[1], [0], [0], [1], [0, 0, 1, 1], [], []>} : vector<4x12xf32>, vector<12x256xf32>, vector<4x256xf32> -> vector<4x256xf32>
    %140 = arith.addf %125, %139 : vector<4x256xf32>
    %c241_i32_53 = arith.constant 241 : i32
    %141 = tpu.dynamic_rotate %106 by %c241_i32_53 dim 1 : vector<4x256xf32>, i32 -> vector<4x256xf32>
    %cst_54 = arith.constant 0.000000e+00 : f32
    %142 = vector.shape_cast %27 : vector<1x256xi1> to vector<1x256xi1>
    %143 = vector.broadcast %142 : vector<1x256xi1> to vector<4x256xi1>
    %144 = vector.broadcast %cst_54 : f32 to vector<4x256xf32>
    %145 = arith.select %143, %141, %144 : vector<4x256xi1>, vector<4x256xf32>
    %c240_i32_55 = arith.constant 240 : i32
    %146 = tpu.dynamic_rotate %106 by %c240_i32_55 dim 1 : vector<4x256xf32>, i32 -> vector<4x256xf32>
    %cst_56 = arith.constant 0.000000e+00 : f32
    %147 = vector.shape_cast %20 : vector<1x256xi1> to vector<1x256xi1>
    %148 = vector.broadcast %147 : vector<1x256xi1> to vector<4x256xi1>
    %149 = vector.broadcast %cst_56 : f32 to vector<4x256xf32>
    %150 = arith.select %148, %146, %149 : vector<4x256xi1>, vector<4x256xf32>
    %c239_i32_57 = arith.constant 239 : i32
    %151 = tpu.dynamic_rotate %106 by %c239_i32_57 dim 1 : vector<4x256xf32>, i32 -> vector<4x256xf32>
    %cst_58 = arith.constant 0.000000e+00 : f32
    %152 = vector.shape_cast %28 : vector<1x256xi1> to vector<1x256xi1>
    %153 = vector.broadcast %152 : vector<1x256xi1> to vector<4x256xi1>
    %154 = vector.broadcast %cst_58 : f32 to vector<4x256xf32>
    %155 = arith.select %153, %151, %154 : vector<4x256xi1>, vector<4x256xf32>
    %156 = tpu.concatenate %145, %150, %155 in 0 : vector<4x256xf32>, vector<4x256xf32>, vector<4x256xf32> -> vector<12x256xf32>
    %c2_59 = arith.constant 2 : index
    %c0_60 = arith.constant 0 : index
    %c0_61 = arith.constant 0 : index
    %157 = vector.load %arg3[%c2_59, %c0_60, %c0_61] : memref<3x4x12xf32, #tpu.memory_space<vmem>>, vector<1x4x12xf32>
    %158 = vector.shape_cast %157 : vector<1x4x12xf32> to vector<4x12xf32>
    %cst_62 = arith.constant dense<0.000000e+00> : vector<4x256xf32>
    %159 = tpu.matmul %158, %156, %cst_62 {dimension_numbers = #tpu.dot_dimension_numbers<[1], [0], [0], [1], [0, 0, 1, 1], [], []>} : vector<4x12xf32>, vector<12x256xf32>, vector<4x256xf32> -> vector<4x256xf32>
    %160 = arith.addf %140, %159 : vector<4x256xf32>
    %cst_63 = arith.constant dense<0.000000e+00> : vector<4xf32>
    %161 = vector.multi_reduction <add>, %160, %cst_63 [1] : vector<4x256xf32> to vector<4xf32>
    %162 = vector.shape_cast %161 : vector<4xf32> to vector<4x1xf32>
    %163 = arith.mulf %160, %160 : vector<4x256xf32>
    %cst_64 = arith.constant dense<0.000000e+00> : vector<4xf32>
    %164 = vector.multi_reduction <add>, %163, %cst_64 [1] : vector<4x256xf32> to vector<4xf32>
    %165 = vector.shape_cast %164 : vector<4xf32> to vector<4x1xf32>
    %cst_65 = arith.constant 3.906250e-03 : f32
    %166 = vector.broadcast %cst_65 : f32 to vector<4x1xf32>
    %167 = arith.mulf %162, %166 : vector<4x1xf32>
    %cst_66 = arith.constant 3.906250e-03 : f32
    %168 = vector.broadcast %cst_66 : f32 to vector<4x1xf32>
    %169 = arith.mulf %165, %168 : vector<4x1xf32>
    %170 = arith.mulf %167, %167 : vector<4x1xf32>
    %171 = arith.subf %169, %170 : vector<4x1xf32>
    %cst_67 = arith.constant 0.000000e+00 : f32
    %172 = vector.broadcast %cst_67 : f32 to vector<4x1xf32>
    %173 = arith.maximumf %171, %172 : vector<4x1xf32>
    %174 = vector.broadcast %167 : vector<4x1xf32> to vector<4x256xf32>
    %175 = arith.subf %160, %174 : vector<4x256xf32>
    %cst_68 = arith.constant 9.99999974E-6 : f32
    %176 = vector.broadcast %cst_68 : f32 to vector<4x1xf32>
    %177 = arith.addf %173, %176 : vector<4x1xf32>
    %178 = math.rsqrt %177 : vector<4x1xf32>
    %179 = vector.broadcast %178 : vector<4x1xf32> to vector<4x256xf32>
    %180 = arith.mulf %175, %179 : vector<4x256xf32>
    %181 = arith.addf %30, %180 : vector<4x256xf32>
    %c0_69 = arith.constant 0 : index
    %c0_70 = arith.constant 0 : index
    %c0_71 = arith.constant 0 : index
    %182 = vector.load %arg4[%c0_69, %c0_70, %c0_71] : memref<1x4x256xf32, #tpu.memory_space<vmem>>, vector<1x4x256xf32>
    %183 = vector.shape_cast %182 : vector<1x4x256xf32> to vector<4x256xf32>
    %184 = vector.shape_cast %181 : vector<4x256xf32> to vector<1x4x256xf32>
    tpu.vector_store %arg4[%c0_69, %c0_70, %c0_71], %184 {strides = array<i32>} : memref<1x4x256xf32, #tpu.memory_space<vmem>>, vector<1x4x256xf32>,
    return
  }
  func.func @transform_0(%arg0: i32) -> (i32, i32, i32) {
    %c0_i32 = arith.constant 0 : i32
    %c0_i32_0 = arith.constant 0 : i32
    %c0_i32_1 = arith.constant 0 : i32
    return %arg0, %c0_i32, %c0_i32_0 : i32, i32, i32
  }
  func.func @transform_1(%arg0: i32) -> (i32, i32, i32) {
    %c0_i32 = arith.constant 0 : i32
    %c0_i32_0 = arith.constant 0 : i32
    %c0_i32_1 = arith.constant 0 : i32
    %c0_i32_2 = arith.constant 0 : i32
    return %c0_i32, %c0_i32_0, %c0_i32_1 : i32, i32, i32
  }
  func.func @transform_2(%arg0: i32) -> (i32, i32, i32) {
    %c0_i32 = arith.constant 0 : i32
    %c0_i32_0 = arith.constant 0 : i32
    %c0_i32_1 = arith.constant 0 : i32
    %c0_i32_2 = arith.constant 0 : i32
    return %c0_i32, %c0_i32_0, %c0_i32_1 : i32, i32, i32
  }
  func.func @transform_3(%arg0: i32) -> (i32, i32, i32) {
    %c0_i32 = arith.constant 0 : i32
    %c0_i32_0 = arith.constant 0 : i32
    %c0_i32_1 = arith.constant 0 : i32
    return %arg0, %c0_i32, %c0_i32_0 : i32, i32, i32
  }
}

</mosaic_0001>

<bundles_post_ra>
// kernel: tpu_custom_call.1
= control target key start
LH: loop header
LB: loop body
LE: loop exit
PB: predicated region body
PF: predicated region fallthrough
CT: control target
= control target key end

     0   :  { %8 = vsyncpa [#allocation3], 0  ;;  %s2074_s0 = inlined_call_operand.hbm [shape: f32[2,4,256], index: 0, kind: input, shape index: {}]   ;;  %s2075_s1 = inlined_call_operand.hbm [shape: f32[3,4,12], index: 1, kind: input, shape index: {}]   ;;  %s2076_s2 = inlined_call_operand.hbm [shape: f32[3,4,12], index: 2, kind: input, shape index: {}]   ;;  %s2077_s3 = inlined_call_operand.hbm [shape: f32[2,4,256], index: 3, kind: output, shape index: {}]  }
   0x1   :  { %10 = vsyncpa [#allocation3 + $0x1], 0 }
   0x2   :  { %11 = vsyncpa [#allocation6], 0 }
   0x3   :  { %12 = vsyncpa [#allocation4], 0 }
   0x4   :  { %14 = vsyncpa [#allocation4 + $0x1], 0  ;;  %s1570_s12 = smov 0   ;;  %s1572_s13 = smov 0  }
   0x5   :  { %s1574_s14 = smov 0   ;;  %s1576_s15 = smov 0  }
   0x6 LB: > { %s1591_s16 = sadd.s32 4294967295, %s1532_s15   ;;  %s1129_s17 = sadd.s32 4294967294, %s1532_s15   ;;  %s1532_s15 = sphi %s1576_s15, %s2141_s15   ;;  %s1528_s14 = sphi %s1574_s14, %s2140_s14   ;;  %s1524_s13 = sphi %s1572_s13, %s2139_s13   ;;  %s1520_s12 = sphi %s1570_s12, %s2138_s12  }
   0x7   : > { %p40_p0 = scmp.ne.s32.totalorder %s1524_s13, %s1520_s12  ;;  %p2078_p1 = scmp.eq.s32.totalorder %s1591_s16, 0 }
   0x8   : > { %p112_p3 = scmp.eq.s32.totalorder %s1129_s17, 1  ;;  %p1130_p5 = scmp.ge.s32.totalorder %s1532_s15, 1 }
   0x9   : > { %p1600_p4 = por %p2078_p1, %p40_p0  ;;  %p119_p7 = scmp.lt.s32.totalorder %s1532_s15, 3 }
   0xa   : > { %p1605_p6 = por %p112_p3, %p40_p0  ;;  %s1534_s21 = smov [#allocation5]  }
   0xb   : > { %s2090_s18 = scalar_select %p1600_p4, 1, 0 }
   0xc   : > { %s2091_s19 = scalar_select %p1605_p6, 1, 0 }
   0xd   : > { %p1610_p8 = pnand %p1130_p5, %p119_p7  ;;  %s131_s22 = sshll.u32 %s1534_s21, 4  ;;  %s1614_s22 = int_to_ptr.vmem [resolvable:$true] %s131_s22 }
   0xe   : > { %s1535_s24 = smov [#allocation7]   ;;  %s1376_s28 = scalar_lea.hbm %s2075_s1, 192 }
   0xf   : > { %p1223_p9 = pneg %p1610_p8  ;;  %s144_s25 = sshll.u32 %s1535_s24, 4  ;;  %s1625_s25 = int_to_ptr.vmem [resolvable:$true] %s144_s25 }
  0x10   : > { %p1377_p12 = scmp.ne.s32.totalorder %s2075_s1, %s1376_s28  ;;  %p1383_p5 = scmp.lt.u32.totalorder %s1376_s28, %s2075_s1 }
  0x11   : > { %p1621_p11 = pnand %p1223_p9, %p2078_p1 }
  0x13   : > { %p1378_p13 = pneg %p1621_p11 }
  0x15   : > { %p1379_p0 = pnand %p1378_p13, %p1377_p12 }
  0x17   : > { %p1380_p3 = pneg %p1379_p0 }
  0x19   : > { %p1385_p7 = pnand %p1383_p5, %p1380_p3 }
  0x1b   : > { %1388 = shalt.err (!%p1385_p7)
}
  0x1c   : > { %s1389_s6 = scalar_lea.vmem %s1614_s22, 192  ;;  %p1397_p2 = scmp.lt.s32.totalorder %s1614_s22, %s1614_s22 }
  0x1d   : > { %p1390_p9 = scmp.ne.s32.totalorder %s1614_s22, %s1389_s6  ;;  %p1398_p12 = scmp.lt.s32.totalorder %s1389_s6, %s1389_s6 }
  0x1f   : > { %p1392_p10 = pnand %p1390_p9, %p1378_p13  ;;  %p1399_p0 = por %p1398_p12, %p1397_p2 }
  0x21   : > { %p1393_p1 = pneg %p1392_p10 }
  0x23   : > { %p1400_p6 = pnand %p1399_p0, %p1393_p1 }
  0x25   : > { %1403 = shalt.err (!%p1400_p6)
}
  0x26   : > { %s1536_s7 = smov 64   ;;  %s1537_s8 = smov 4  }
  0x27   : > { %1226 = dma.hbm_to_vmem [thread:$0]  (!%p1621_p11), %s2075_s1, 192, %s1614_s22, [#allocation6], %s1536_s7, %s1536_s7, %s1537_s8  }
  0x28   : > { %s1404_s21 = scalar_lea.hbm %s2076_s2, 192 }
  0x29   : > { %p1405_p2 = scmp.ne.s32.totalorder %s2076_s2, %s1404_s21  ;;  %p1411_p10 = scmp.lt.u32.totalorder %s1404_s21, %s2076_s2 }
  0x2b   : > { %p1407_p1 = pnand %p1405_p2, %p1378_p13 }
  0x2d   : > { %p1408_p6 = pneg %p1407_p1 }
  0x2f   : > { %p1413_p3 = pnand %p1411_p10, %p1408_p6 }
  0x31   : > { %1416 = shalt.err (!%p1413_p3)
}
  0x32   : > { %s1417_s22 = scalar_lea.vmem %s1625_s25, 192  ;;  %p1425_p12 = scmp.lt.s32.totalorder %s1625_s25, %s1625_s25 }
  0x33   : > { %p1418_p5 = scmp.ne.s32.totalorder %s1625_s25, %s1417_s22  ;;  %p1426_p0 = scmp.lt.s32.totalorder %s1417_s22, %s1417_s22 }
  0x35   : > { %p1420_p7 = pnand %p1418_p5, %p1378_p13  ;;  %p1427_p2 = por %p1426_p0, %p1425_p12 }
  0x37   : > { %p1421_p9 = pneg %p1420_p7 }
  0x39   : > { %p1428_p1 = pnand %p1427_p2, %p1421_p9 }
  0x3b   : > { %1431 = shalt.err (!%p1428_p1)
}
  0x3c   : > { %1229 = dma.hbm_to_vmem [thread:$0]  (!%p1621_p11), %s2076_s2, 192, %s1625_s25, [#allocation6], %s1536_s7, %s1536_s7, %s1537_s8  }
  0x3d   : > { %s1680_s4 = sadd.s32 1, %s1532_s15   ;;  %s27_s23 = sadd.s32 1, %s1528_s14 }
  0x3e   : > { %s24_s5 = ssub.s32 %s1532_s15, %s1680_s4  ;;  %p34_p13 = scmp.ne.s32.totalorder %s1528_s14, %s1524_s13 }
  0x3f   : > { %p25_p6 = scmp.eq.s32.totalorder %s24_s5, 0  ;;  %p35_p10 = scmp.eq.s32.totalorder %s1532_s15, 0 }
  0x40   : > { %p2094_p3 = scmp.eq.s32.totalorder %s1591_s16, 1  ;;  %p1240_p7 = scmp.lt.s32.totalorder %s1532_s15, 2 }
  0x41   : > { %s1696_s9 = scalar_select %p25_p6, %s1528_s14, %s27_s23  }
  0x42   : > { %p1690_p5 = por %p2094_p3, %p34_p13  ;;  %p36_p9 = por %p35_p10, %p34_p13 }
  0x43   : > { %s158_s10 = sand.u32 1, %s1528_s14   ;;  %s1165_s25 = sshll.u32 %s1532_s15, 7 }
  0x44   : > { %s2095_s6 = scalar_select %p1690_p5, 1, 0 }
  0x45   : > { %s1134_s11 = sshll.u32 %s158_s10, 3  ;;  %s1703_s17 = scalar_lea.hbm %s2074_s0, %s1165_s25 }
  0x46   : > { %s162_s21 = scalar_lea.vmem [#allocation2], %s1134_s11  ;;  %p1707_p11 = pnand %p1240_p7, %p36_p9 }
  0x47   : > { %s170_s24 = sshll.u32 %s162_s21, 4  ;;  %s159_s27 = scalar_lea.sflag [#allocation3], %s158_s10  ;;  %s1705_s24 = int_to_ptr.vmem [resolvable:$true] %s170_s24 }
  0x48   : > { %s1432_s28 = scalar_lea.hbm %s1703_s17, 128  ;;  %p1434_p0 = pneg %p1707_p11 }
  0x49   : > { %p1433_p12 = scmp.ne.s32.totalorder %s1703_s17, %s1432_s28  ;;  %s1437_s30 = scalar_lea.hbm %s2074_s0, 256 }
  0x4a   : > { %p1438_p13 = scmp.lt.u32.totalorder %s1703_s17, %s2074_s0  ;;  %p1439_p6 = scmp.lt.u32.totalorder %s1437_s30, %s1432_s28 }
  0x4b   : > { %p1435_p2 = pnand %p1434_p0, %p1433_p12  ;;  %p1441_p3 = scmp.lt.u32.totalorder %s1432_s28, %s1703_s17 }
  0x4c   : > { %p1440_p10 = por %p1439_p6, %p1438_p13 }
  0x4d   : > { %p1436_p1 = pneg %p1435_p2 }
  0x4e   : > { %p1442_p7 = por %p1441_p3, %p1440_p10 }
  0x50   : > { %p1443_p9 = pnand %p1442_p7, %p1436_p1 }
  0x52   : > { %1446 = shalt.err (!%p1443_p9)
}
  0x53   : > { %s1447_s10 = scalar_lea.vmem %s1705_s24, 128  ;;  %s1538_s11 = smov [#allocation2]  }
  0x54   : > { %p1448_p12 = scmp.ne.s32.totalorder %s1705_s24, %s1447_s10  ;;  %s1452_s25 = sshll.u32 %s1538_s11, 4  ;;  %s1453_s25 = int_to_ptr.vmem [resolvable:$false] %s1452_s25 }
  0x55   : > { %s1454_s7 = scalar_lea.vmem %s1453_s25, 256  ;;  %p1455_p4 = scmp.lt.s32.totalorder %s1705_s24, %s1453_s25 }
  0x56   : > { %p1450_p2 = pnand %p1448_p12, %p1434_p0  ;;  %p1456_p13 = scmp.lt.s32.totalorder %s1454_s7, %s1447_s10 }
  0x58   : > { %p1451_p5 = pneg %p1450_p2  ;;  %p1457_p6 = por %p1456_p13, %p1455_p4 }
  0x5a   : > { %p1458_p10 = pnand %p1457_p6, %p1451_p5 }
  0x5c   : > { %1461 = shalt.err (!%p1458_p10)
}
  0x5d   : > { %1233 = dma.hbm_to_vmem [thread:$0]  (!%p1707_p11), %s1703_s17, 128, %s1705_s24, %s159_s27  }
  0x5e   : > { %179 = sbr.rel (%p1610_p8) target bundleno = 1187 (0x4a3), region = 32  ;;  %s1739_s8 = sand.u32 (!%p1610_p8), 1, %s1524_s13  }
  0x5f   : > { %s1138_s21 = sshll.u32 (!%p1610_p8), %s1739_s8, 3  ;;  %s182_s28 = scalar_lea.sflag (!%p1610_p8), [#allocation3], %s1739_s8 }
  0x60   : > { %s185_s22 = scalar_lea.vmem (!%p1610_p8), [#allocation2], %s1138_s21  ;;  %p2097_p4 = scmp.ne.s32.totalorder (!%p1610_p8), %s2090_s18, 0 }
  0x65   : > { %1507 = dma.done.wait (%p2097_p4), %s182_s28, 128  }
  0x66   : > { %1509 = vsyncadd (%p2097_p4), %s182_s28, 4294967168  ;;  %p2098_p5 = scmp.eq.s32.totalorder %s1591_s16, 0 }
  0x68   : > { %1511 = dma.done.wait (%p2098_p5), [#allocation6], 384   ;;  %p2099_p8 = pmov %p2098_p5 }
  0x69   : > { %v1753_v0 = vld [vmem:[%s185_s22] sm:$0xff]  ;;  %s1539_s20 = smov 1   ;;  %s1540_s17 = smov 16   ;;  %v1541_v3 = vmov 0.0   ;;  %v216_v4 = vlaneseq  ;;  %vm308_vm1 = vcmask 1043456   ;;  %vm2086_vm14 = vcmask 97280  }
  0x6a   : > { %1513 = vsyncadd (%p2099_p8), [#allocation6], 4294966912  ;;  %v261_v1 = vcombine.high %v1753_v0, %v1753_v0  ;;  %418 = vmatprep.mubr.f32.mxu0 %v1541_v3  ;;  %793 = vmatprep.mubr.f32.mxu1 %v1541_v3  ;;  %s1542_s18 = smov 127   ;;  %s1543_s24 = smov 17   ;;  %v338_v19 = vcombine.low %v1753_v0, %v1753_v0  ;;  %v913_v13 = vld [vmem:[#allocation7 + $0x8] sm:$0xf] }
  0x6b   : > { %s1544_s26 = smov 15   ;;  %s1545_s27 = smov 112   ;;  %v1768_v5 = vand.u32 127, %v216_v4 }
  0x6c   : > { %v1290_v2 = vpack.i.bf16 %v261_v1, %v1753_v0  ;;  %s1546_s29 = smov 113   ;;  %s1547_s30 = smov 111  }
  0x6d   : > { %v1771_v6 = vadd.s32 128, %v1768_v5  ;;  %v223_v7 = vand.u32 15, %v1768_v5  ;;  %vm2082_vm0 = vcmp.lt.s32.totalorder %v1768_v5, 1  ;;  %vm2083_vm2 = vcmp.ge.s32.totalorder %v1768_v5, 16  ;;  %s1166_s23 = sshll.u32 %s1591_s16, 7  ;;  %s215_s5 = scalar_lea.vmem [#allocation8], %s1138_s21 }
  0x6e   : > { %1291 = vrot.lane.b32.xlu0 %v1290_v2, %s1539_s20  ;;  %1301 = vrot.lane.b32.xlu1 %v1290_v2, %s1540_s17  ;;  %vm2081_vm3 = vcmp.lt.s32.totalorder %v1768_v5, 16  ;;  %vm2084_vm4 = vcmp.lt.s32.totalorder %v1768_v5, 17  ;;  %vm329_vm5 = vcmp.lt.s32.totalorder %v1768_v5, 127  ;;  %vm2085_vm9 = vcmp.lt.s32.totalorder %v1768_v5, 15  ;;  %s1040_s10 = sshll.u32 %s215_s5, 4  ;;  %s2030_s7 = scalar_lea.hbm %s2077_s3, %s1166_s23  ;;  %s2032_s10 = int_to_ptr.vmem [resolvable:$true] %s1040_s10 }
  0x6f   : > { %v230_v8 = vand.u32 15, %v1771_v6  ;;  %vm1780_vm6 = vcmp.gt.s32.totalorder %v223_v7, 0  ;;  %vm1788_vm8 = vcmp.lt.s32.totalorder %v223_v7, 15  ;;  %vm2089_vm11 = vcmp.lt.s32.totalorder %v1771_v6, 240  ;;  %s1026_s28 = scalar_lea.sflag [#allocation4], %s1739_s8  ;;  %s1462_s22 = scalar_lea.vmem %s2032_s10, 128 }
  0x70   : > { %vm522_vm12 = vcmp.lt.s32.totalorder %v1768_v5, 112  ;;  %vm2087_vm13 = vcmp.lt.s32.totalorder %v1768_v5, 113  ;;  %vm1820_vm15 = vmand %vm2083_vm2, %vm1780_vm6  ;;  %p1463_p11 = scmp.ne.s32.totalorder %s2032_s10, %s1462_s22  ;;  %p2135_p0 = scmp.ne.s32.totalorder %s2095_s6, 0 }
  0x71   : > { %vm1784_vm7 = vcmp.gt.s32.totalorder %v230_v8, 0  ;;  %vm1793_vm10 = vcmp.lt.s32.totalorder %v230_v8, 15  ;;  %s1549_s16 = smov [#allocation8]  }
  0x72   : > { %1296 = vrot.lane.b32.xlu0 %v1290_v2, %s1542_s18  ;;  %1306 = vrot.lane.b32.xlu1 %v1290_v2, %s1543_s24  ;;  %p1464_p1 = pnand %p1463_p11, %p2135_p0  ;;  %s1466_s21 = sshll.u32 %s1549_s16, 4  ;;  %s1467_s21 = int_to_ptr.vmem [resolvable:$false] %s1466_s21 }
  0x73   : > { %p1469_p7 = scmp.lt.s32.totalorder %s2032_s10, %s1467_s21 }
  0x74   : > { %p1465_p3 = pneg %p1464_p1 }
  0x76   : > { %1311 = vrot.lane.b32.xlu0 %v1290_v2, %s1544_s26  ;;  %1316 = vrot.lane.b32.xlu1 %v1290_v2, %s1545_s27 }
  0x7a   : > { %1321 = vrot.lane.b32.xlu0 %v1290_v2, %s1546_s29  ;;  %1326 = vrot.lane.b32.xlu1 %v1290_v2, %s1547_s30 }
  0xe0   : > { %v1292_v9 = vpop.permute.xlu0 %1291  ;;  %v1302_v10 = vpop.permute.xlu1 %1301 }
  0xe1   : > { %v1294_v14 = vunpack.i.h.bf16 %v1292_v9  ;;  %v1293_v15 = vunpack.i.l.bf16 %v1292_v9  ;;  %v1304_v16 = vunpack.i.h.bf16 %v1302_v10  ;;  %v1303_v17 = vunpack.i.l.bf16 %v1302_v10  ;;  %v343_v10 = vld [vmem:[#allocation5 + $0x4] sm:$0xf] }
  0xe3   : > { %v318_v20 = vsel %vm2082_vm0, %v1294_v14, %v1293_v15  ;;  %v281_v21 = vsel %vm2081_vm3, %v1303_v17, %v1304_v16  ;;  %v282_v22 = vsel %vm2081_vm3, %v1304_v16, %v1303_v17  ;;  %v317_v23 = vsel %vm2082_vm0, %v1293_v15, %v1294_v14  ;;  %vm1840_vm0 = vmand %vm2083_vm2, %vm1788_vm8 }
  0xe4   : > { %v287_v24 = vsel %vm2083_vm2, %v282_v22, 0.0  ;;  %v1297_v25 = vpop.permute.xlu0 %1296  ;;  %v1307_v26 = vpop.permute.xlu1 %1306  ;;  %v324_v27 = vsel %vm1784_vm7, %v317_v23, 0.0  ;;  %v323_v28 = vsel %vm1780_vm6, %v318_v20, 0.0  ;;  %v305_v33 = vrot.slane %v281_v21, 4 }
  0xe5   : > { %v1299_v29 = vunpack.i.h.bf16 %v1297_v25  ;;  %v1298_v30 = vunpack.i.l.bf16 %v1297_v25  ;;  %v1309_v31 = vunpack.i.h.bf16 %v1307_v26  ;;  %v304_v32 = vrot.slane %v287_v24, 4 }
  0xe6   : > { %v1308_v35 = vunpack.i.l.bf16 %v1307_v26  ;;  %vm2088_vm3 = vcmp.lt.s32.totalorder %v1768_v5, 111  ;;  %v341_v37 = vsel %vm308_vm1, %v324_v27, %v1753_v0  ;;  %v340_v39 = vsel %vm308_vm1, %v323_v28, %v338_v19 }
  0xe7   : > { %v331_v36 = vsel %vm329_vm5, %v1299_v29, %v1298_v30  ;;  %v330_v38 = vsel %vm329_vm5, %v1298_v30, %v1299_v29  ;;  %vm1548_vm2 = vmmov 1  }
  0xe8   : > { %v268_v40 = vsel %vm2084_vm4, %v1308_v35, %v1309_v31  ;;  %v269_v41 = vsel %vm2084_vm4, %v1309_v31, %v1308_v35  ;;  %v1312_v43 = vpop.permute.xlu0 %1311  ;;  %v337_v44 = vsel %vm1793_vm10, %v331_v36, 0.0  ;;  %v1317_v45 = vpop.permute.xlu1 %1316  ;;  %v336_v46 = vsel %vm1788_vm8, %v330_v38, 0.0  ;;  %vm1853_vm4 = vmpackc.low %vm308_vm1, %vm1548_vm2  ;;  %v311_v35 = vld [vmem:[#allocation5] sm:$0xf]  ;;  %v553_v36 = vld [vmem:[#allocation5 + $0x8] sm:$0xf] }
  0xe9   : > { %v274_v47 = vsel %vm1820_vm15, %v269_v41, 0.0  ;;  %v275_v48 = vsel %vm1784_vm7, %v268_v40, 0.0  ;;  %v1314_v49 = vunpack.i.h.bf16 %v1312_v43  ;;  %v1313_v50 = vunpack.i.l.bf16 %v1312_v43  ;;  %vm1881_vm2 = vmand %vm2089_vm11, %vm1784_vm7 }
  0xea   : > { %v309_v52 = vsel %vm308_vm1, %v274_v47, %v304_v32  ;;  %v1167_v53 = vpack.c.bf16 %v337_v44, %v341_v37  ;;  %v1319_v54 = vunpack.i.h.bf16 %v1317_v45  ;;  %v1318_v55 = vunpack.i.l.bf16 %v1317_v45 }
  0xeb   : > { %v294_v56 = vsel %vm2085_vm9, %v1313_v50, %v1314_v49  ;;  %v295_v57 = vsel %vm2085_vm9, %v1314_v49, %v1313_v50  ;;  %v1170_v58 = vpack.c.bf16 %v336_v46, %v340_v39  ;;  %v310_v59 = vsel %vm308_vm1, %v275_v48, %v305_v33  ;;  %vm1889_vm9 = vmand %vm2089_vm11, %vm1793_vm10 }
  0xec   : > { %v300_v60 = vsel %vm1840_vm0, %v295_v57, 0.0  ;;  %v301_v61 = vsel %vm1793_vm10, %v294_v56, 0.0  ;;  %1169 = vmatprep.subr.msk.bf16.mxu0 %vm1853_vm4, %v1167_v53  ;;  %v523_v62 = vsel %vm522_vm12, %v1318_v55, %v1319_v54  ;;  %v524_v63 = vsel %vm522_vm12, %v1319_v54, %v1318_v55  ;;  %v1322_v1 = vpop.permute.xlu0 %1321  ;;  %v1327_v2 = vpop.permute.xlu1 %1326 }
  0xed   : > { %v1176_v4 = vpack.c.bf16 %v300_v60, %v309_v52  ;;  %v530_v7 = vsel %vm2089_vm11, %v524_v63, 0.0  ;;  %v546_v8 = vrot.slane %v523_v62, 4  ;;  %1172 = vmatpush1.bf16.msk.msra.mxu0 %vm1853_vm4, %v1170_v58  ;;  %v1324_v9 = vunpack.i.h.bf16 %v1322_v1 }
  0xee   : > { %v547_v14 = vrot.slane %v530_v7, 4  ;;  %v1323_v16 = vunpack.i.l.bf16 %v1322_v1  ;;  %v1173_v17 = vpack.c.bf16 %v301_v61, %v310_v59  ;;  %v1329_v19 = vunpack.i.h.bf16 %v1327_v2 }
  0xef   : > { %v1328_v21 = vunpack.i.l.bf16 %v1327_v2  ;;  %vm2124_vm11 = vcmp.ge.s32.totalorder %v1768_v5, 16 }
  0xf0   : > { %v510_v22 = vsel %vm2087_vm13, %v1323_v16, %v1324_v9  ;;  %v511_v23 = vsel %vm2087_vm13, %v1324_v9, %v1323_v16  ;;  %1144 = vmatmul.mubr.msk.f32.vlgmr.msra.gmra.mrb[0].mxu0 %vm2086_vm14, %v343_v10  ;;  %1175 = vmatprep.subr.msk.bf16.mxu0 %vm1853_vm4, %v1173_v17 }
  0xf1   : > { %v516_v24 = vsel %vm1780_vm6, %v510_v22, 0.0  ;;  %v517_v25 = vsel %vm1881_vm2, %v511_v23, 0.0  ;;  %v536_v26 = vsel %vm2088_vm3, %v1328_v21, %v1329_v19  ;;  %v537_v27 = vsel %vm2088_vm3, %v1329_v19, %v1328_v21  ;;  %1178 = vmatpush1.bf16.msk.msra.mxu0 %vm1853_vm4, %v1176_v4  ;;  %498 = vmatprep.mubr.f32.mxu0 %v1541_v3 }
  0xf2   : > { %v542_v28 = vsel %vm1788_vm8, %v536_v26, 0.0  ;;  %v543_v29 = vsel %vm1889_vm9, %v537_v27, 0.0  ;;  %v550_v30 = vsel %vm308_vm1, %v516_v24, %v546_v8  ;;  %v551_v31 = vsel %vm308_vm1, %v517_v25, %v547_v14 }
  0xf3   : > { %v1179_v32 = vpack.c.bf16 %v543_v29, %v551_v31  ;;  %v1182_v33 = vpack.c.bf16 %v542_v28, %v550_v30 }
  0xf5   : > { %1181 = vmatprep.subr.msk.bf16.mxu0 %vm1853_vm4, %v1179_v32 }
  0xf8   : > { %1147 = vmatmul.mubr.msk.f32.vlgmr.msra.gmra.mrb[0].mxu0 %vm2086_vm14, %v311_v35 }
  0xf9   : > { %1184 = vmatpush1.bf16.msk.msra.mxu0 %vm1853_vm4, %v1182_v33  ;;  %627 = vmatprep.mubr.f32.mxu0 %v1541_v3 }
 0x100   : > { %1150 = vmatmul.mubr.msk.f32.vlgmr.msra.gmra.mrb[0].mxu0 %vm2086_vm14, %v553_v36  ;;  %vm2118_vm14 = vcmp.lt.s32.totalorder %v1768_v5, 1 }
 0x101   : > { %vm2119_vm13 = vmmov %vm2118_vm14 }
 0x1d3   : > { %v629_v37 = vpop.f32.mrb[0].mxu0 }
 0x1d4   : > { %v641_v38 = vmul.f32 %v629_v37, %v629_v37  ;;  %v631_v39 = vpop.f32.mrb[1].mxu0  ;;  %v636_v40 = vsel %vm308_vm1, %v629_v37, 0.0 }
 0x1d5   : > { %v637_v41 = vsel %vm308_vm1, %v631_v39, 0.0  ;;  %v642_v43 = vmul.f32 %v631_v39, %v631_v39 }
 0x1d6   : > { %v638_v44 = vadd.f32 %v637_v41, %v636_v40  ;;  %v643_v45 = vsel %vm308_vm1, %v641_v38, 0.0 }
 0x1d7   : > { %v644_v46 = vsel %vm308_vm1, %v642_v43, 0.0 }
 0x1d8   : > { %639 = vadd.xlane.f32.xlu0 %v638_v44  ;;  %v645_v47 = vadd.f32 %v644_v46, %v643_v45 }
 0x1da   : > { %646 = vadd.xlane.f32.xlu1 %v645_v47 }
 0x265   : > { %v640_v48 = vpop.xlane.xlu0 %639 }
 0x266   : > { %v648_v49 = vmul.f32 0.00390625, %v640_v48 }
 0x267   : > { %v647_v50 = vpop.xlane.xlu1 %646 }
 0x268   : > { %v649_v52 = vmul.f32 0.00390625, %v647_v50  ;;  %v650_v53 = vmul.f32 %v648_v49, %v648_v49  ;;  %v653_v57 = vsub.f32 %v629_v37, %v648_v49  ;;  %v654_v58 = vsub.f32 %v631_v39, %v648_v49 }
 0x26a   : > { %v651_v54 = vsub.f32 %v649_v52, %v650_v53 }
 0x26c   : > { %v652_v55 = vmax.f32 %v651_v54, 0.0 }
 0x26e   : > { %v655_v56 = vadd.f32 1e-05, %v652_v55 }
 0x270   : > { %1372 = vrsqrt.f32 %v655_v56 }
 0x27a   : > { %v1373_v59 = vpop.eup %1372 }
 0x27b   : > { %v657_v60 = vmul.f32 %v1373_v59, %v653_v57  ;;  %v658_v61 = vmul.f32 %v1373_v59, %v654_v58 }
 0x27d   : > { %v659_v62 = vmax.f32 %v657_v60, 0.0  ;;  %v660_v63 = vmax.f32 %v658_v61, 0.0 }
 0x27f   : > { %v1335_v1 = vpack.i.bf16 %v660_v63, %v659_v62  ;;  %v713_v24 = vrot.slane %v660_v63, 4  ;;  %v712_v26 = vrot.slane %v659_v62, 4  ;;  %v719_v63 = vld [vmem:[#allocation7 + $0x4] sm:$0xf] }
 0x281   : > { %1336 = vrot.lane.b32.xlu1 %v1335_v1, %s1542_s18  ;;  %1331 = vrot.lane.b32.xlu0 %v1335_v1, %s1539_s20  ;;  %s1468_s20 = scalar_lea.vmem %s1467_s21, 256 }
 0x282   : > { %p1470_p9 = scmp.lt.s32.totalorder %s1468_s20, %s1462_s22 }
 0x284   : > { %p1471_p12 = por %p1470_p9, %p1469_p7 }
 0x285   : > { %1346 = vrot.lane.b32.xlu1 %v1335_v1, %s1543_s24  ;;  %1341 = vrot.lane.b32.xlu0 %v1335_v1, %s1540_s17 }
 0x286   : > { %p1472_p2 = pnand %p1471_p12, %p1465_p3 }
 0x289   : > { %1356 = vrot.lane.b32.xlu1 %v1335_v1, %s1545_s27  ;;  %1351 = vrot.lane.b32.xlu0 %v1335_v1, %s1544_s26 }
 0x28d   : > { %1366 = vrot.lane.b32.xlu1 %v1335_v1, %s1547_s30  ;;  %1361 = vrot.lane.b32.xlu0 %v1335_v1, %s1546_s29 }
 0x2f3   : > { %v1337_v2 = vpop.permute.xlu1 %1336  ;;  %v1332_v4 = vpop.permute.xlu0 %1331 }
 0x2f4   : > { %v1339_v7 = vunpack.i.h.bf16 %v1337_v2  ;;  %v1338_v8 = vunpack.i.l.bf16 %v1337_v2  ;;  %v1334_v9 = vunpack.i.h.bf16 %v1332_v4  ;;  %v1333_v10 = vunpack.i.l.bf16 %v1332_v4 }
 0x2f6   : > { %v699_v14 = vsel %vm2118_vm14, %v1334_v9, %v1333_v10  ;;  %v698_v16 = vsel %vm2119_vm13, %v1333_v10, %v1334_v9  ;;  %v707_v17 = vsel %vm329_vm5, %v1339_v7, %v1338_v8  ;;  %v706_v19 = vsel %vm329_vm5, %v1338_v8, %v1339_v7 }
 0x2f7   : > { %v1347_v21 = vpop.permute.xlu1 %1346  ;;  %v1342_v22 = vpop.permute.xlu0 %1341  ;;  %v701_v23 = vsel %vm1784_vm7, %v698_v16, 0.0  ;;  %v700_v25 = vsel %vm1780_vm6, %v699_v14, 0.0  ;;  %v709_v31 = vsel %vm1793_vm10, %v707_v17, 0.0  ;;  %v708_v33 = vsel %vm1788_vm8, %v706_v19, 0.0 }
 0x2f8   : > { %v1349_v27 = vunpack.i.h.bf16 %v1347_v21  ;;  %v1348_v28 = vunpack.i.l.bf16 %v1347_v21  ;;  %v1344_v29 = vunpack.i.h.bf16 %v1342_v22  ;;  %v1343_v30 = vunpack.i.l.bf16 %v1342_v22 }
 0x2f9   : > { %v717_v32 = vsel %vm308_vm1, %v701_v23, %v713_v24  ;;  %v716_v35 = vsel %vm308_vm1, %v700_v25, %v712_v26  ;;  %vm2120_vm5 = vcmp.lt.s32.totalorder %v1768_v5, 17  ;;  %vm2122_vm14 = vcmp.lt.s32.totalorder %v1768_v5, 16  ;;  %v693_v25 = vld [vmem:[#allocation7] sm:$0xf] }
 0x2fa   : > { %v665_v36 = vsel %vm2120_vm5, %v1348_v28, %v1349_v27  ;;  %vm2121_vm13 = vmmov %vm2120_vm5  ;;  %v673_v38 = vsel %vm2122_vm14, %v1343_v30, %v1344_v29  ;;  %v1185_v53 = vpack.c.bf16 %v709_v31, %v717_v32  ;;  %v1188_v54 = vpack.c.bf16 %v708_v33, %v716_v35 }
 0x2fb   : > { %v666_v37 = vsel %vm2121_vm13, %v1349_v27, %v1348_v28  ;;  %vm2123_vm3 = vmmov %vm2122_vm14  ;;  %v688_v43 = vrot.slane %v673_v38, 4  ;;  %v1357_v44 = vpop.permute.xlu1 %1356  ;;  %v1352_v45 = vpop.permute.xlu0 %1351  ;;  %v668_v50 = vsel %vm1784_vm7, %v665_v36, 0.0  ;;  %vm2128_vm7 = vcmp.lt.s32.totalorder %v1768_v5, 111 }
 0x2fc   : > { %v674_v39 = vsel %vm2123_vm3, %v1344_v29, %v1343_v30  ;;  %v667_v40 = vsel %vm1820_vm15, %v666_v37, 0.0  ;;  %v1359_v47 = vunpack.i.h.bf16 %v1357_v44  ;;  %v1358_v48 = vunpack.i.l.bf16 %v1357_v44  ;;  %1187 = vmatprep.subr.msk.bf16.mxu1 %vm1853_vm4, %v1185_v53 }
 0x2fd   : > { %v675_v41 = vsel %vm2124_vm11, %v674_v39, 0.0  ;;  %v1354_v49 = vunpack.i.h.bf16 %v1352_v45  ;;  %v1353_v52 = vunpack.i.l.bf16 %v1352_v45  ;;  %vm2125_vm3 = vcmp.lt.s32.totalorder %v1771_v6, 240  ;;  %1190 = vmatpush1.bf16.msk.msra.mxu1 %vm1853_vm4, %v1188_v54 }
 0x2fe   : > { %v687_v46 = vrot.slane %v675_v41, 4  ;;  %v893_v34 = vsel %vm522_vm12, %v1359_v47, %v1358_v48  ;;  %v892_v56 = vsel %vm522_vm12, %v1358_v48, %v1359_v47  ;;  %vm2126_vm11 = vcmp.lt.s32.totalorder %v1768_v5, 15 }
 0x2ff   : > { %v895_v57 = vsel %vm2125_vm3, %v893_v34, 0.0  ;;  %v681_v58 = vsel %vm2126_vm11, %v1353_v52, %v1354_v49  ;;  %vm2127_vm15 = vmmov %vm2126_vm11  ;;  %v1367_v59 = vpop.permute.xlu1 %1366  ;;  %v1362_v60 = vpop.permute.xlu0 %1361  ;;  %v692_v1 = vsel %vm308_vm1, %v668_v50, %v688_v43  ;;  %v906_v9 = vrot.slane %v892_v56, 4 }
 0x300   : > { %v691_v55 = vsel %vm308_vm1, %v667_v40, %v687_v46  ;;  %v682_v12 = vsel %vm2127_vm15, %v1354_v49, %v1353_v52  ;;  %v684_v62 = vsel %vm1793_vm10, %v681_v58, 0.0  ;;  %v1369_v6 = vunpack.i.h.bf16 %v1367_v59 }
 0x301   : > { %v683_v61 = vsel %vm1840_vm0, %v682_v12, 0.0  ;;  %v1368_v4 = vunpack.i.l.bf16 %v1367_v59  ;;  %v1364_v7 = vunpack.i.h.bf16 %v1362_v60  ;;  %v1363_v8 = vunpack.i.l.bf16 %v1362_v60  ;;  %vm2129_vm0 = vmmov %vm2128_vm7 }
 0x302   : > { %v1194_v2 = vpack.c.bf16 %v683_v61, %v691_v55  ;;  %v907_v10 = vrot.slane %v895_v57, 4  ;;  %v1191_v14 = vpack.c.bf16 %v684_v62, %v692_v1  ;;  %vm2130_vm10 = vcmp.lt.s32.totalorder %v1768_v5, 113 }
 0x303   : > { %v900_v42 = vsel %vm2128_vm7, %v1368_v4, %v1369_v6  ;;  %v901_v18 = vsel %vm2129_vm0, %v1369_v6, %v1368_v4  ;;  %v884_v16 = vsel %vm2130_vm10, %v1363_v8, %v1364_v7  ;;  %vm2131_vm12 = vmmov %vm2130_vm10  ;;  %vm2132_vm5 = vcmask 97280  }
 0x304   : > { %v885_v17 = vsel %vm2131_vm12, %v1364_v7, %v1363_v8  ;;  %1153 = vmatmul.mubr.msk.f32.vlgmr.msra.gmra.mrb[0].mxu1 %vm2132_vm5, %v719_v63  ;;  %v903_v19 = vsel %vm1889_vm9, %v901_v18, 0.0  ;;  %v886_v21 = vsel %vm1780_vm6, %v884_v16, 0.0  ;;  %1193 = vmatprep.subr.msk.bf16.mxu1 %vm1853_vm4, %v1191_v14  ;;  %v902_v5 = vsel %vm1788_vm8, %v900_v42, 0.0  ;;  %vm2133_vm6 = vmmov %vm2132_vm5 }
 0x305   : > { %v887_v22 = vsel %vm1881_vm2, %v885_v17, 0.0  ;;  %873 = vmatprep.mubr.f32.mxu1 %v1541_v3  ;;  %v910_v23 = vsel %vm308_vm1, %v886_v21, %v906_v9  ;;  %1196 = vmatpush1.bf16.msk.msra.mxu1 %vm1853_vm4, %v1194_v2  ;;  %vm2134_vm8 = vmmov %vm2132_vm5 }
 0x306   : > { %v911_v20 = vsel %vm308_vm1, %v887_v22, %v907_v10  ;;  %v1200_v24 = vpack.c.bf16 %v902_v5, %v910_v23 }
 0x307   : > { %v1197_v11 = vpack.c.bf16 %v903_v19, %v911_v20 }
 0x309   : > { %1199 = vmatprep.subr.msk.bf16.mxu1 %vm1853_vm4, %v1197_v11 }
 0x30c   : > { %1156 = vmatmul.mubr.msk.f32.vlgmr.msra.gmra.mrb[0].mxu1 %vm2133_vm6, %v693_v25 }
 0x30d   : > { %1202 = vmatpush1.bf16.msk.msra.mxu1 %vm1853_vm4, %v1200_v24  ;;  %987 = vmatprep.mubr.f32.mxu1 %v1541_v3 }
 0x314   : > { %1159 = vmatmul.mubr.msk.f32.vlgmr.msra.gmra.mrb[0].mxu1 %vm2134_vm8, %v913_v13 }
 0x3e7   : > { %v989_v15 = vpop.f32.mrb[0].mxu1 }
 0x3e8   : > { %v1001_v26 = vmul.f32 %v989_v15, %v989_v15  ;;  %v991_v27 = vpop.f32.mrb[1].mxu1  ;;  %v996_v28 = vsel %vm308_vm1, %v989_v15, 0.0 }
 0x3e9   : > { %v997_v29 = vsel %vm308_vm1, %v991_v27, 0.0  ;;  %v1002_v30 = vmul.f32 %v991_v27, %v991_v27 }
 0x3ea   : > { %v998_v31 = vadd.f32 %v997_v29, %v996_v28  ;;  %v1003_v32 = vsel %vm308_vm1, %v1001_v26, 0.0 }
 0x3eb   : > { %v1004_v33 = vsel %vm308_vm1, %v1002_v30, 0.0 }
 0x3ec   : > { %999 = vadd.xlane.f32.xlu0 %v998_v31  ;;  %v1005_v51 = vadd.f32 %v1004_v33, %v1003_v32 }
 0x3ee   : > { %1006 = vadd.xlane.f32.xlu1 %v1005_v51 }
 0x479   : > { %v1000_v3 = vpop.xlane.xlu0 %999 }
 0x47a   : > { %v1008_v35 = vmul.f32 0.00390625, %v1000_v3 }
 0x47b   : > { %v1007_v36 = vpop.xlane.xlu1 %1006 }
 0x47c   : > { %v1009_v37 = vmul.f32 0.00390625, %v1007_v36  ;;  %v1010_v38 = vmul.f32 %v1008_v35, %v1008_v35  ;;  %v1013_v43 = vsub.f32 %v989_v15, %v1008_v35  ;;  %v1014_v44 = vsub.f32 %v991_v27, %v1008_v35 }
 0x47e   : > { %v1011_v39 = vsub.f32 %v1009_v37, %v1010_v38 }
 0x480   : > { %v1012_v40 = vmax.f32 %v1011_v39, 0.0 }
 0x482   : > { %v1015_v41 = vadd.f32 1e-05, %v1012_v40 }
 0x484   : > { %1374 = vrsqrt.f32 %v1015_v41 }
 0x48e   : > { %v1375_v45 = vpop.eup %1374 }
 0x48f   : > { %v1017_v46 = vmul.f32 %v1375_v45, %v1013_v43  ;;  %v1018_v47 = vmul.f32 %v1375_v45, %v1014_v44 }
 0x491   : > { %v1021_v48 = vcombine.low %v1017_v46, %v1018_v47 }
 0x493   : > { %v1023_v49 = vadd.f32 %v1021_v48, %v1753_v0 }
 0x495   : > { %1024 = vst [vmem:[%s215_s5] sm:$0xff] %v1023_v49 }
 0x496   : > { %1475 = shalt.err (!%p1472_p2)
}
 0x497   : > { %s1476_s8 = scalar_lea.hbm %s2030_s7, 128  ;;  %s1480_s24 = scalar_lea.hbm %s2077_s3, 256 }
 0x498   : > { %p1477_p13 = scmp.ne.s32.totalorder %s2030_s7, %s1476_s8  ;;  %p1481_p4 = scmp.lt.u32.totalorder %s2030_s7, %s2077_s3 }
 0x499   : > { %p1482_p5 = scmp.lt.u32.totalorder %s1480_s24, %s1476_s8  ;;  %p1484_p11 = scmp.lt.u32.totalorder %s1476_s8, %s2030_s7 }
 0x49a   : > { %p1478_p6 = pnand %p1477_p13, %p2135_p0 }
 0x49b   : > { %p1483_p8 = por %p1482_p5, %p1481_p4 }
 0x49c   : > { %p1479_p10 = pneg %p1478_p6 }
 0x49d   : > { %p1485_p1 = por %p1484_p11, %p1483_p8 }
 0x49f   : > { %p1486_p3 = pnand %p1485_p1, %p1479_p10 }
 0x4a1   : > { %1489 = shalt.err (!%p1486_p3)
}
 0x4a2   : > { %1221 = dma.vmem_to_hbm [thread:$0]  (%p2135_p0), %s2032_s10, 128, %s2030_s7, %s1026_s28  }
 0x4a3 PF: > { %s1052_s29 = sand.u32 1, %s1520_s12   ;;  %p2136_p7 = scmp.ne.s32.totalorder %s2091_s19, 0 }
 0x4a4   : > { %p2137_p9 = scmp.ge.s32.totalorder %s1532_s15, 2  ;;  %s1053_s30 = scalar_lea.sflag [#allocation4], %s1052_s29 }
 0x4a6   : > { %p1235_p12 = pnand %p2137_p9, %p2136_p7 }
 0x4a8   : > { %1515 = dma.done.wait (!%p1235_p12), %s1053_s30, 128  }
 0x4a9   : > { %1517 = vsyncadd (!%p1235_p12), %s1053_s30, 4294967168  ;;  %p17_p2 = scmp.ge.s32.totalorder %s1680_s4, 4   ;;  %s2138_s12 = smov %s1524_s13 }
 0x4aa   : > { %s2139_s13 = smov %s1528_s14  ;;  %s2140_s14 = smov %s1696_s9 }
 0x4ab   : > { %s2141_s15 = smov %s1680_s4  ;;  %19 = sbr.rel (!%p17_p2) target bundleno = 6 (0x6), region = 89 }
 0x4b2   :  { %1058 = vsyncpa [#allocation3], 1 }
 0x4b3   :  { %1060 = vsyncpa [#allocation3 + $0x1], 1 }
 0x4b4   :  { %1061 = vsyncpa [#allocation6], 1 }
 0x4b5   :  { %1062 = vsyncpa [#allocation4], 1 }
 0x4b6   :  { %1064 = vsyncpa [#allocation4 + $0x1], 1 }

// kernel: tpu_custom_call.1
= control target key start
LH: loop header
LB: loop body
LE: loop exit
PB: predicated region body
PF: predicated region fallthrough
CT: control target
= control target key end

     0   :  { %8 = vsyncpa [#allocation3], 0  ;;  %s2074_s0 = inlined_call_operand.hbm [shape: f32[2,4,256], index: 0, kind: input, shape index: {}]   ;;  %s2075_s1 = inlined_call_operand.hbm [shape: f32[3,4,12], index: 1, kind: input, shape index: {}]   ;;  %s2076_s2 = inlined_call_operand.hbm [shape: f32[3,4,12], index: 2, kind: input, shape index: {}]   ;;  %s2077_s3 = inlined_call_operand.hbm [shape: f32[2,4,256], index: 3, kind: output, shape index: {}]  }
   0x1   :  { %10 = vsyncpa [#allocation3 + $0x1], 0 }
   0x2   :  { %11 = vsyncpa [#allocation6], 0 }
   0x3   :  { %12 = vsyncpa [#allocation4], 0 }
   0x4   :  { %14 = vsyncpa [#allocation4 + $0x1], 0  ;;  %s1570_s12 = smov 0   ;;  %s1572_s13 = smov 0  }
   0x5   :  { %s1574_s14 = smov 0   ;;  %s1576_s15 = smov 0  }
   0x6 LB: > { %s1591_s16 = sadd.s32 4294967295, %s1532_s15   ;;  %s1129_s17 = sadd.s32 4294967294, %s1532_s15   ;;  %s1532_s15 = sphi %s1576_s15, %s2141_s15   ;;  %s1528_s14 = sphi %s1574_s14, %s2140_s14   ;;  %s1524_s13 = sphi %s1572_s13, %s2139_s13   ;;  %s1520_s12 = sphi %s1570_s12, %s2138_s12  }
   0x7   : > { %p40_p0 = scmp.ne.s32.totalorder %s1524_s13, %s1520_s12  ;;  %p2078_p1 = scmp.eq.s32.totalorder %s1591_s16, 0 }
   0x8   : > { %p112_p3 = scmp.eq.s32.totalorder %s1129_s17, 1  ;;  %p1130_p5 = scmp.ge.s32.totalorder %s1532_s15, 1 }
   0x9   : > { %p1600_p4 = por %p2078_p1, %p40_p0  ;;  %p119_p7 = scmp.lt.s32.totalorder %s1532_s15, 3 }
   0xa   : > { %p1605_p6 = por %p112_p3, %p40_p0  ;;  %s1534_s21 = smov [#allocation5]  }
   0xb   : > { %s2090_s18 = scalar_select %p1600_p4, 1, 0 }
   0xc   : > { %s2091_s19 = scalar_select %p1605_p6, 1, 0 }
   0xd   : > { %p1610_p8 = pnand %p1130_p5, %p119_p7  ;;  %s131_s22 = sshll.u32 %s1534_s21, 4  ;;  %s1614_s22 = int_to_ptr.vmem [resolvable:$true] %s131_s22 }
   0xe   : > { %s1535_s24 = smov [#allocation7]   ;;  %s1376_s28 = scalar_lea.hbm %s2075_s1, 192 }
   0xf   : > { %p1223_p9 = pneg %p1610_p8  ;;  %s144_s25 = sshll.u32 %s1535_s24, 4  ;;  %s1625_s25 = int_to_ptr.vmem [resolvable:$true] %s144_s25 }
  0x10   : > { %p1377_p12 = scmp.ne.s32.totalorder %s2075_s1, %s1376_s28  ;;  %p1383_p5 = scmp.lt.u32.totalorder %s1376_s28, %s2075_s1 }
  0x11   : > { %p1621_p11 = pnand %p1223_p9, %p2078_p1 }
  0x13   : > { %p1378_p13 = pneg %p1621_p11 }
  0x15   : > { %p1379_p0 = pnand %p1378_p13, %p1377_p12 }
  0x17   : > { %p1380_p3 = pneg %p1379_p0 }
  0x19   : > { %p1385_p7 = pnand %p1383_p5, %p1380_p3 }
  0x1b   : > { %1388 = shalt.err (!%p1385_p7)
}
  0x1c   : > { %s1389_s6 = scalar_lea.vmem %s1614_s22, 192  ;;  %p1397_p2 = scmp.lt.s32.totalorder %s1614_s22, %s1614_s22 }
  0x1d   : > { %p1390_p9 = scmp.ne.s32.totalorder %s1614_s22, %s1389_s6  ;;  %p1398_p12 = scmp.lt.s32.totalorder %s1389_s6, %s1389_s6 }
  0x1f   : > { %p1392_p10 = pnand %p1390_p9, %p1378_p13  ;;  %p1399_p0 = por %p1398_p12, %p1397_p2 }
  0x21   : > { %p1393_p1 = pneg %p1392_p10 }
  0x23   : > { %p1400_p6 = pnand %p1399_p0, %p1393_p1 }
  0x25   : > { %1403 = shalt.err (!%p1400_p6)
}
  0x26   : > { %s1536_s7 = smov 64   ;;  %s1537_s8 = smov 4  }
  0x27   : > { %1226 = dma.hbm_to_vmem [thread:$0]  (!%p1621_p11), %s2075_s1, 192, %s1614_s22, [#allocation6], %s1536_s7, %s1536_s7, %s1537_s8  }
  0x28   : > { %s1404_s21 = scalar_lea.hbm %s2076_s2, 192 }
  0x29   : > { %p1405_p2 = scmp.ne.s32.totalorder %s2076_s2, %s1404_s21  ;;  %p1411_p10 = scmp.lt.u32.totalorder %s1404_s21, %s2076_s2 }
  0x2b   : > { %p1407_p1 = pnand %p1405_p2, %p1378_p13 }
  0x2d   : > { %p1408_p6 = pneg %p1407_p1 }
  0x2f   : > { %p1413_p3 = pnand %p1411_p10, %p1408_p6 }
  0x31   : > { %1416 = shalt.err (!%p1413_p3)
}
  0x32   : > { %s1417_s22 = scalar_lea.vmem %s1625_s25, 192  ;;  %p1425_p12 = scmp.lt.s32.totalorder %s1625_s25, %s1625_s25 }
  0x33   : > { %p1418_p5 = scmp.ne.s32.totalorder %s1625_s25, %s1417_s22  ;;  %p1426_p0 = scmp.lt.s32.totalorder %s1417_s22, %s1417_s22 }
  0x35   : > { %p1420_p7 = pnand %p1418_p5, %p1378_p13  ;;  %p1427_p2 = por %p1426_p0, %p1425_p12 }
  0x37   : > { %p1421_p9 = pneg %p1420_p7 }
  0x39   : > { %p1428_p1 = pnand %p1427_p2, %p1421_p9 }
  0x3b   : > { %1431 = shalt.err (!%p1428_p1)
}
  0x3c   : > { %1229 = dma.hbm_to_vmem [thread:$0]  (!%p1621_p11), %s2076_s2, 192, %s1625_s25, [#allocation6], %s1536_s7, %s1536_s7, %s1537_s8  }
  0x3d   : > { %s1680_s4 = sadd.s32 1, %s1532_s15   ;;  %s27_s23 = sadd.s32 1, %s1528_s14 }
  0x3e   : > { %s24_s5 = ssub.s32 %s1532_s15, %s1680_s4  ;;  %p34_p13 = scmp.ne.s32.totalorder %s1528_s14, %s1524_s13 }
  0x3f   : > { %p25_p6 = scmp.eq.s32.totalorder %s24_s5, 0  ;;  %p35_p10 = scmp.eq.s32.totalorder %s1532_s15, 0 }
  0x40   : > { %p2094_p3 = scmp.eq.s32.totalorder %s1591_s16, 1  ;;  %p1240_p7 = scmp.lt.s32.totalorder %s1532_s15, 2 }
  0x41   : > { %s1696_s9 = scalar_select %p25_p6, %s1528_s14, %s27_s23  }
  0x42   : > { %p1690_p5 = por %p2094_p3, %p34_p13  ;;  %p36_p9 = por %p35_p10, %p34_p13 }
  0x43   : > { %s158_s10 = sand.u32 1, %s1528_s14   ;;  %s1165_s25 = sshll.u32 %s1532_s15, 7 }
  0x44   : > { %s2095_s6 = scalar_select %p1690_p5, 1, 0 }
  0x45   : > { %s1134_s11 = sshll.u32 %s158_s10, 3  ;;  %s1703_s17 = scalar_lea.hbm %s2074_s0, %s1165_s25 }
  0x46   : > { %s162_s21 = scalar_lea.vmem [#allocation2], %s1134_s11  ;;  %p1707_p11 = pnand %p1240_p7, %p36_p9 }
  0x47   : > { %s170_s24 = sshll.u32 %s162_s21, 4  ;;  %s159_s27 = scalar_lea.sflag [#allocation3], %s158_s10  ;;  %s1705_s24 = int_to_ptr.vmem [resolvable:$true] %s170_s24 }
  0x48   : > { %s1432_s28 = scalar_lea.hbm %s1703_s17, 128  ;;  %p1434_p0 = pneg %p1707_p11 }
  0x49   : > { %p1433_p12 = scmp.ne.s32.totalorder %s1703_s17, %s1432_s28  ;;  %s1437_s30 = scalar_lea.hbm %s2074_s0, 256 }
  0x4a   : > { %p1438_p13 = scmp.lt.u32.totalorder %s1703_s17, %s2074_s0  ;;  %p1439_p6 = scmp.lt.u32.totalorder %s1437_s30, %s1432_s28 }
  0x4b   : > { %p1435_p2 = pnand %p1434_p0, %p1433_p12  ;;  %p1441_p3 = scmp.lt.u32.totalorder %s1432_s28, %s1703_s17 }
  0x4c   : > { %p1440_p10 = por %p1439_p6, %p1438_p13 }
  0x4d   : > { %p1436_p1 = pneg %p1435_p2 }
  0x4e   : > { %p1442_p7 = por %p1441_p3, %p1440_p10 }
  0x50   : > { %p1443_p9 = pnand %p1442_p7, %p1436_p1 }
  0x52   : > { %1446 = shalt.err (!%p1443_p9)
}
  0x53   : > { %s1447_s10 = scalar_lea.vmem %s1705_s24, 128  ;;  %s1538_s11 = smov [#allocation2]  }
  0x54   : > { %p1448_p12 = scmp.ne.s32.totalorder %s1705_s24, %s1447_s10  ;;  %s1452_s25 = sshll.u32 %s1538_s11, 4  ;;  %s1453_s25 = int_to_ptr.vmem [resolvable:$false] %s1452_s25 }
  0x55   : > { %s1454_s7 = scalar_lea.vmem %s1453_s25, 256  ;;  %p1455_p4 = scmp.lt.s32.totalorder %s1705_s24, %s1453_s25 }
  0x56   : > { %p1450_p2 = pnand %p1448_p12, %p1434_p0  ;;  %p1456_p13 = scmp.lt.s32.totalorder %s1454_s7, %s1447_s10 }
  0x58   : > { %p1451_p5 = pneg %p1450_p2  ;;  %p1457_p6 = por %p1456_p13, %p1455_p4 }
  0x5a   : > { %p1458_p10 = pnand %p1457_p6, %p1451_p5 }
  0x5c   : > { %1461 = shalt.err (!%p1458_p10)
}
  0x5d   : > { %1233 = dma.hbm_to_vmem [thread:$0]  (!%p1707_p11), %s1703_s17, 128, %s1705_s24, %s159_s27  }
  0x5e   : > { %179 = sbr.rel (%p1610_p8) target bundleno = 1187 (0x4a3), region = 32  ;;  %s1739_s8 = sand.u32 (!%p1610_p8), 1, %s1524_s13  }
  0x5f   : > { %s1138_s21 = sshll.u32 (!%p1610_p8), %s1739_s8, 3  ;;  %s182_s28 = scalar_lea.sflag (!%p1610_p8), [#allocation3], %s1739_s8 }
  0x60   : > { %s185_s22 = scalar_lea.vmem (!%p1610_p8), [#allocation2], %s1138_s21  ;;  %p2097_p4 = scmp.ne.s32.totalorder (!%p1610_p8), %s2090_s18, 0 }
  0x65   : > { %1507 = dma.done.wait (%p2097_p4), %s182_s28, 128  }
  0x66   : > { %1509 = vsyncadd (%p2097_p4), %s182_s28, 4294967168  ;;  %p2098_p5 = scmp.eq.s32.totalorder %s1591_s16, 0 }
  0x68   : > { %1511 = dma.done.wait (%p2098_p5), [#allocation6], 384   ;;  %p2099_p8 = pmov %p2098_p5 }
  0x69   : > { %v1753_v0 = vld [vmem:[%s185_s22] sm:$0xff]  ;;  %s1539_s20 = smov 1   ;;  %s1540_s17 = smov 16   ;;  %v1541_v3 = vmov 0.0   ;;  %v216_v4 = vlaneseq  ;;  %vm308_vm1 = vcmask 1043456   ;;  %vm2086_vm14 = vcmask 97280  }
  0x6a   : > { %1513 = vsyncadd (%p2099_p8), [#allocation6], 4294966912  ;;  %v261_v1 = vcombine.high %v1753_v0, %v1753_v0  ;;  %418 = vmatprep.mubr.f32.mxu0 %v1541_v3  ;;  %793 = vmatprep.mubr.f32.mxu1 %v1541_v3  ;;  %s1542_s18 = smov 127   ;;  %s1543_s24 = smov 17   ;;  %v338_v19 = vcombine.low %v1753_v0, %v1753_v0  ;;  %v913_v13 = vld [vmem:[#allocation7 + $0x8] sm:$0xf] }
  0x6b   : > { %s1544_s26 = smov 15   ;;  %s1545_s27 = smov 112   ;;  %v1768_v5 = vand.u32 127, %v216_v4 }
  0x6c   : > { %v1290_v2 = vpack.i.bf16 %v261_v1, %v1753_v0  ;;  %s1546_s29 = smov 113   ;;  %s1547_s30 = smov 111  }
  0x6d   : > { %v1771_v6 = vadd.s32 128, %v1768_v5  ;;  %v223_v7 = vand.u32 15, %v1768_v5  ;;  %vm2082_vm0 = vcmp.lt.s32.totalorder %v1768_v5, 1  ;;  %vm2083_vm2 = vcmp.ge.s32.totalorder %v1768_v5, 16  ;;  %s1166_s23 = sshll.u32 %s1591_s16, 7  ;;  %s215_s5 = scalar_lea.vmem [#allocation8], %s1138_s21 }
  0x6e   : > { %1291 = vrot.lane.b32.xlu0 %v1290_v2, %s1539_s20  ;;  %1301 = vrot.lane.b32.xlu1 %v1290_v2, %s1540_s17  ;;  %vm2081_vm3 = vcmp.lt.s32.totalorder %v1768_v5, 16  ;;  %vm2084_vm4 = vcmp.lt.s32.totalorder %v1768_v5, 17  ;;  %vm329_vm5 = vcmp.lt.s32.totalorder %v1768_v5, 127  ;;  %vm2085_vm9 = vcmp.lt.s32.totalorder %v1768_v5, 15  ;;  %s1040_s10 = sshll.u32 %s215_s5, 4  ;;  %s2030_s7 = scalar_lea.hbm %s2077_s3, %s1166_s23  ;;  %s2032_s10 = int_to_ptr.vmem [resolvable:$true] %s1040_s10 }
  0x6f   : > { %v230_v8 = vand.u32 15, %v1771_v6  ;;  %vm1780_vm6 = vcmp.gt.s32.totalorder %v223_v7, 0  ;;  %vm1788_vm8 = vcmp.lt.s32.totalorder %v223_v7, 15  ;;  %vm2089_vm11 = vcmp.lt.s32.totalorder %v1771_v6, 240  ;;  %s1026_s28 = scalar_lea.sflag [#allocation4], %s1739_s8  ;;  %s1462_s22 = scalar_lea.vmem %s2032_s10, 128 }
  0x70   : > { %vm522_vm12 = vcmp.lt.s32.totalorder %v1768_v5, 112  ;;  %vm2087_vm13 = vcmp.lt.s32.totalorder %v1768_v5, 113  ;;  %vm1820_vm15 = vmand %vm2083_vm2, %vm1780_vm6  ;;  %p1463_p11 = scmp.ne.s32.totalorder %s2032_s10, %s1462_s22  ;;  %p2135_p0 = scmp.ne.s32.totalorder %s2095_s6, 0 }
  0x71   : > { %vm1784_vm7 = vcmp.gt.s32.totalorder %v230_v8, 0  ;;  %vm1793_vm10 = vcmp.lt.s32.totalorder %v230_v8, 15  ;;  %s1549_s16 = smov [#allocation8]  }
  0x72   : > { %1296 = vrot.lane.b32.xlu0 %v1290_v2, %s1542_s18  ;;  %1306 = vrot.lane.b32.xlu1 %v1290_v2, %s1543_s24  ;;  %p1464_p1 = pnand %p1463_p11, %p2135_p0  ;;  %s1466_s21 = sshll.u32 %s1549_s16, 4  ;;  %s1467_s21 = int_to_ptr.vmem [resolvable:$false] %s1466_s21 }
  0x73   : > { %p1469_p7 = scmp.lt.s32.totalorder %s2032_s10, %s1467_s21 }
  0x74   : > { %p1465_p3 = pneg %p1464_p1 }
  0x76   : > { %1311 = vrot.lane.b32.xlu0 %v1290_v2, %s1544_s26  ;;  %1316 = vrot.lane.b32.xlu1 %v1290_v2, %s1545_s27 }
  0x7a   : > { %1321 = vrot.lane.b32.xlu0 %v1290_v2, %s1546_s29  ;;  %1326 = vrot.lane.b32.xlu1 %v1290_v2, %s1547_s30 }
  0xe0   : > { %v1292_v9 = vpop.permute.xlu0 %1291  ;;  %v1302_v10 = vpop.permute.xlu1 %1301 }
  0xe1   : > { %v1294_v14 = vunpack.i.h.bf16 %v1292_v9  ;;  %v1293_v15 = vunpack.i.l.bf16 %v1292_v9  ;;  %v1304_v16 = vunpack.i.h.bf16 %v1302_v10  ;;  %v1303_v17 = vunpack.i.l.bf16 %v1302_v10  ;;  %v343_v10 = vld [vmem:[#allocation5 + $0x4] sm:$0xf] }
  0xe3   : > { %v318_v20 = vsel %vm2082_vm0, %v1294_v14, %v1293_v15  ;;  %v281_v21 = vsel %vm2081_vm3, %v1303_v17, %v1304_v16  ;;  %v282_v22 = vsel %vm2081_vm3, %v1304_v16, %v1303_v17  ;;  %v317_v23 = vsel %vm2082_vm0, %v1293_v15, %v1294_v14  ;;  %vm1840_vm0 = vmand %vm2083_vm2, %vm1788_vm8 }
  0xe4   : > { %v287_v24 = vsel %vm2083_vm2, %v282_v22, 0.0  ;;  %v1297_v25 = vpop.permute.xlu0 %1296  ;;  %v1307_v26 = vpop.permute.xlu1 %1306  ;;  %v324_v27 = vsel %vm1784_vm7, %v317_v23, 0.0  ;;  %v323_v28 = vsel %vm1780_vm6, %v318_v20, 0.0  ;;  %v305_v33 = vrot.slane %v281_v21, 4 }
  0xe5   : > { %v1299_v29 = vunpack.i.h.bf16 %v1297_v25  ;;  %v1298_v30 = vunpack.i.l.bf16 %v1297_v25  ;;  %v1309_v31 = vunpack.i.h.bf16 %v1307_v26  ;;  %v304_v32 = vrot.slane %v287_v24, 4 }
  0xe6   : > { %v1308_v35 = vunpack.i.l.bf16 %v1307_v26  ;;  %vm2088_vm3 = vcmp.lt.s32.totalorder %v1768_v5, 111  ;;  %v341_v37 = vsel %vm308_vm1, %v324_v27, %v1753_v0  ;;  %v340_v39 = vsel %vm308_vm1, %v323_v28, %v338_v19 }
  0xe7   : > { %v331_v36 = vsel %vm329_vm5, %v1299_v29, %v1298_v30  ;;  %v330_v38 = vsel %vm329_vm5, %v1298_v30, %v1299_v29  ;;  %vm1548_vm2 = vmmov 1  }
  0xe8   : > { %v268_v40 = vsel %vm2084_vm4, %v1308_v35, %v1309_v31  ;;  %v269_v41 = vsel %vm2084_vm4, %v1309_v31, %v1308_v35  ;;  %v1312_v43 = vpop.permute.xlu0 %1311  ;;  %v337_v44 = vsel %vm1793_vm10, %v331_v36, 0.0  ;;  %v1317_v45 = vpop.permute.xlu1 %1316  ;;  %v336_v46 = vsel %vm1788_vm8, %v330_v38, 0.0  ;;  %vm1853_vm4 = vmpackc.low %vm308_vm1, %vm1548_vm2  ;;  %v311_v35 = vld [vmem:[#allocation5] sm:$0xf]  ;;  %v553_v36 = vld [vmem:[#allocation5 + $0x8] sm:$0xf] }
  0xe9   : > { %v274_v47 = vsel %vm1820_vm15, %v269_v41, 0.0  ;;  %v275_v48 = vsel %vm1784_vm7, %v268_v40, 0.0  ;;  %v1314_v49 = vunpack.i.h.bf16 %v1312_v43  ;;  %v1313_v50 = vunpack.i.l.bf16 %v1312_v43  ;;  %vm1881_vm2 = vmand %vm2089_vm11, %vm1784_vm7 }
  0xea   : > { %v309_v52 = vsel %vm308_vm1, %v274_v47, %v304_v32  ;;  %v1167_v53 = vpack.c.bf16 %v337_v44, %v341_v37  ;;  %v1319_v54 = vunpack.i.h.bf16 %v1317_v45  ;;  %v1318_v55 = vunpack.i.l.bf16 %v1317_v45 }
  0xeb   : > { %v294_v56 = vsel %vm2085_vm9, %v1313_v50, %v1314_v49  ;;  %v295_v57 = vsel %vm2085_vm9, %v1314_v49, %v1313_v50  ;;  %v1170_v58 = vpack.c.bf16 %v336_v46, %v340_v39  ;;  %v310_v59 = vsel %vm308_vm1, %v275_v48, %v305_v33  ;;  %vm1889_vm9 = vmand %vm2089_vm11, %vm1793_vm10 }
  0xec   : > { %v300_v60 = vsel %vm1840_vm0, %v295_v57, 0.0  ;;  %v301_v61 = vsel %vm1793_vm10, %v294_v56, 0.0  ;;  %1169 = vmatprep.subr.msk.bf16.mxu0 %vm1853_vm4, %v1167_v53  ;;  %v523_v62 = vsel %vm522_vm12, %v1318_v55, %v1319_v54  ;;  %v524_v63 = vsel %vm522_vm12, %v1319_v54, %v1318_v55  ;;  %v1322_v1 = vpop.permute.xlu0 %1321  ;;  %v1327_v2 = vpop.permute.xlu1 %1326 }
  0xed   : > { %v1176_v4 = vpack.c.bf16 %v300_v60, %v309_v52  ;;  %v530_v7 = vsel %vm2089_vm11, %v524_v63, 0.0  ;;  %v546_v8 = vrot.slane %v523_v62, 4  ;;  %1172 = vmatpush1.bf16.msk.msra.mxu0 %vm1853_vm4, %v1170_v58  ;;  %v1324_v9 = vunpack.i.h.bf16 %v1322_v1 }
  0xee   : > { %v547_v14 = vrot.slane %v530_v7, 4  ;;  %v1323_v16 = vunpack.i.l.bf16 %v1322_v1  ;;  %v1173_v17 = vpack.c.bf16 %v301_v61, %v310_v59  ;;  %v1329_v19 = vunpack.i.h.bf16 %v1327_v2 }
  0xef   : > { %v1328_v21 = vunpack.i.l.bf16 %v1327_v2  ;;  %vm2124_vm11 = vcmp.ge.s32.totalorder %v1768_v5, 16 }
  0xf0   : > { %v510_v22 = vsel %vm2087_vm13, %v1323_v16, %v1324_v9  ;;  %v511_v23 = vsel %vm2087_vm13, %v1324_v9, %v1323_v16  ;;  %1144 = vmatmul.mubr.msk.f32.vlgmr.msra.gmra.mrb[0].mxu0 %vm2086_vm14, %v343_v10  ;;  %1175 = vmatprep.subr.msk.bf16.mxu0 %vm1853_vm4, %v1173_v17 }
  0xf1   : > { %v516_v24 = vsel %vm1780_vm6, %v510_v22, 0.0  ;;  %v517_v25 = vsel %vm1881_vm2, %v511_v23, 0.0  ;;  %v536_v26 = vsel %vm2088_vm3, %v1328_v21, %v1329_v19  ;;  %v537_v27 = vsel %vm2088_vm3, %v1329_v19, %v1328_v21  ;;  %1178 = vmatpush1.bf16.msk.msra.mxu0 %vm1853_vm4, %v1176_v4  ;;  %498 = vmatprep.mubr.f32.mxu0 %v1541_v3 }
  0xf2   : > { %v542_v28 = vsel %vm1788_vm8, %v536_v26, 0.0  ;;  %v543_v29 = vsel %vm1889_vm9, %v537_v27, 0.0  ;;  %v550_v30 = vsel %vm308_vm1, %v516_v24, %v546_v8  ;;  %v551_v31 = vsel %vm308_vm1, %v517_v25, %v547_v14 }
  0xf3   : > { %v1179_v32 = vpack.c.bf16 %v543_v29, %v551_v31  ;;  %v1182_v33 = vpack.c.bf16 %v542_v28, %v550_v30 }
  0xf5   : > { %1181 = vmatprep.subr.msk.bf16.mxu0 %vm1853_vm4, %v1179_v32 }
  0xf8   : > { %1147 = vmatmul.mubr.msk.f32.vlgmr.msra.gmra.mrb[0].mxu0 %vm2086_vm14, %v311_v35 }
  0xf9   : > { %1184 = vmatpush1.bf16.msk.msra.mxu0 %vm1853_vm4, %v1182_v33  ;;  %627 = vmatprep.mubr.f32.mxu0 %v1541_v3 }
 0x100   : > { %1150 = vmatmul.mubr.msk.f32.vlgmr.msra.gmra.mrb[0].mxu0 %vm2086_vm14, %v553_v36  ;;  %vm2118_vm14 = vcmp.lt.s32.totalorder %v1768_v5, 1 }
 0x101   : > { %vm2119_vm13 = vmmov %vm2118_vm14 }
 0x1d3   : > { %v629_v37 = vpop.f32.mrb[0].mxu0 }
 0x1d4   : > { %v641_v38 = vmul.f32 %v629_v37, %v629_v37  ;;  %v631_v39 = vpop.f32.mrb[1].mxu0  ;;  %v636_v40 = vsel %vm308_vm1, %v629_v37, 0.0 }
 0x1d5   : > { %v637_v41 = vsel %vm308_vm1, %v631_v39, 0.0  ;;  %v642_v43 = vmul.f32 %v631_v39, %v631_v39 }
 0x1d6   : > { %v638_v44 = vadd.f32 %v637_v41, %v636_v40  ;;  %v643_v45 = vsel %vm308_vm1, %v641_v38, 0.0 }
 0x1d7   : > { %v644_v46 = vsel %vm308_vm1, %v642_v43, 0.0 }
 0x1d8   : > { %639 = vadd.xlane.f32.xlu0 %v638_v44  ;;  %v645_v47 = vadd.f32 %v644_v46, %v643_v45 }
 0x1da   : > { %646 = vadd.xlane.f32.xlu1 %v645_v47 }
 0x265   : > { %v640_v48 = vpop.xlane.xlu0 %639 }
 0x266   : > { %v648_v49 = vmul.f32 0.00390625, %v640_v48 }
 0x267   : > { %v647_v50 = vpop.xlane.xlu1 %646 }
 0x268   : > { %v649_v52 = vmul.f32 0.00390625, %v647_v50  ;;  %v650_v53 = vmul.f32 %v648_v49, %v648_v49  ;;  %v653_v57 = vsub.f32 %v629_v37, %v648_v49  ;;  %v654_v58 = vsub.f32 %v631_v39, %v648_v49 }
 0x26a   : > { %v651_v54 = vsub.f32 %v649_v52, %v650_v53 }
 0x26c   : > { %v652_v55 = vmax.f32 %v651_v54, 0.0 }
 0x26e   : > { %v655_v56 = vadd.f32 1e-05, %v652_v55 }
 0x270   : > { %1372 = vrsqrt.f32 %v655_v56 }
 0x27a   : > { %v1373_v59 = vpop.eup %1372 }
 0x27b   : > { %v657_v60 = vmul.f32 %v1373_v59, %v653_v57  ;;  %v658_v61 = vmul.f32 %v1373_v59, %v654_v58 }
 0x27d   : > { %v659_v62 = vmax.f32 %v657_v60, 0.0  ;;  %v660_v63 = vmax.f32 %v658_v61, 0.0 }
 0x27f   : > { %v1335_v1 = vpack.i.bf16 %v660_v63, %v659_v62  ;;  %v713_v24 = vrot.slane %v660_v63, 4  ;;  %v712_v26 = vrot.slane %v659_v62, 4  ;;  %v719_v63 = vld [vmem:[#allocation7 + $0x4] sm:$0xf] }
 0x281   : > { %1336 = vrot.lane.b32.xlu1 %v1335_v1, %s1542_s18  ;;  %1331 = vrot.lane.b32.xlu0 %v1335_v1, %s1539_s20  ;;  %s1468_s20 = scalar_lea.vmem %s1467_s21, 256 }
 0x282   : > { %p1470_p9 = scmp.lt.s32.totalorder %s1468_s20, %s1462_s22 }
 0x284   : > { %p1471_p12 = por %p1470_p9, %p1469_p7 }
 0x285   : > { %1346 = vrot.lane.b32.xlu1 %v1335_v1, %s1543_s24  ;;  %1341 = vrot.lane.b32.xlu0 %v1335_v1, %s1540_s17 }
 0x286   : > { %p1472_p2 = pnand %p1471_p12, %p1465_p3 }
 0x289   : > { %1356 = vrot.lane.b32.xlu1 %v1335_v1, %s1545_s27  ;;  %1351 = vrot.lane.b32.xlu0 %v1335_v1, %s1544_s26 }
 0x28d   : > { %1366 = vrot.lane.b32.xlu1 %v1335_v1, %s1547_s30  ;;  %1361 = vrot.lane.b32.xlu0 %v1335_v1, %s1546_s29 }
 0x2f3   : > { %v1337_v2 = vpop.permute.xlu1 %1336  ;;  %v1332_v4 = vpop.permute.xlu0 %1331 }
 0x2f4   : > { %v1339_v7 = vunpack.i.h.bf16 %v1337_v2  ;;  %v1338_v8 = vunpack.i.l.bf16 %v1337_v2  ;;  %v1334_v9 = vunpack.i.h.bf16 %v1332_v4  ;;  %v1333_v10 = vunpack.i.l.bf16 %v1332_v4 }
 0x2f6   : > { %v699_v14 = vsel %vm2118_vm14, %v1334_v9, %v1333_v10  ;;  %v698_v16 = vsel %vm2119_vm13, %v1333_v10, %v1334_v9  ;;  %v707_v17 = vsel %vm329_vm5, %v1339_v7, %v1338_v8  ;;  %v706_v19 = vsel %vm329_vm5, %v1338_v8, %v1339_v7 }
 0x2f7   : > { %v1347_v21 = vpop.permute.xlu1 %1346  ;;  %v1342_v22 = vpop.permute.xlu0 %1341  ;;  %v701_v23 = vsel %vm1784_vm7, %v698_v16, 0.0  ;;  %v700_v25 = vsel %vm1780_vm6, %v699_v14, 0.0  ;;  %v709_v31 = vsel %vm1793_vm10, %v707_v17, 0.0  ;;  %v708_v33 = vsel %vm1788_vm8, %v706_v19, 0.0 }
 0x2f8   : > { %v1349_v27 = vunpack.i.h.bf16 %v1347_v21  ;;  %v1348_v28 = vunpack.i.l.bf16 %v1347_v21  ;;  %v1344_v29 = vunpack.i.h.bf16 %v1342_v22  ;;  %v1343_v30 = vunpack.i.l.bf16 %v1342_v22 }
 0x2f9   : > { %v717_v32 = vsel %vm308_vm1, %v701_v23, %v713_v24  ;;  %v716_v35 = vsel %vm308_vm1, %v700_v25, %v712_v26  ;;  %vm2120_vm5 = vcmp.lt.s32.totalorder %v1768_v5, 17  ;;  %vm2122_vm14 = vcmp.lt.s32.totalorder %v1768_v5, 16  ;;  %v693_v25 = vld [vmem:[#allocation7] sm:$0xf] }
 0x2fa   : > { %v665_v36 = vsel %vm2120_vm5, %v1348_v28, %v1349_v27  ;;  %vm2121_vm13 = vmmov %vm2120_vm5  ;;  %v673_v38 = vsel %vm2122_vm14, %v1343_v30, %v1344_v29  ;;  %v1185_v53 = vpack.c.bf16 %v709_v31, %v717_v32  ;;  %v1188_v54 = vpack.c.bf16 %v708_v33, %v716_v35 }
 0x2fb   : > { %v666_v37 = vsel %vm2121_vm13, %v1349_v27, %v1348_v28  ;;  %vm2123_vm3 = vmmov %vm2122_vm14  ;;  %v688_v43 = vrot.slane %v673_v38, 4  ;;  %v1357_v44 = vpop.permute.xlu1 %1356  ;;  %v1352_v45 = vpop.permute.xlu0 %1351  ;;  %v668_v50 = vsel %vm1784_vm7, %v665_v36, 0.0  ;;  %vm2128_vm7 = vcmp.lt.s32.totalorder %v1768_v5, 111 }
 0x2fc   : > { %v674_v39 = vsel %vm2123_vm3, %v1344_v29, %v1343_v30  ;;  %v667_v40 = vsel %vm1820_vm15, %v666_v37, 0.0  ;;  %v1359_v47 = vunpack.i.h.bf16 %v1357_v44  ;;  %v1358_v48 = vunpack.i.l.bf16 %v1357_v44  ;;  %1187 = vmatprep.subr.msk.bf16.mxu1 %vm1853_vm4, %v1185_v53 }
 0x2fd   : > { %v675_v41 = vsel %vm2124_vm11, %v674_v39, 0.0  ;;  %v1354_v49 = vunpack.i.h.bf16 %v1352_v45  ;;  %v1353_v52 = vunpack.i.l.bf16 %v1352_v45  ;;  %vm2125_vm3 = vcmp.lt.s32.totalorder %v1771_v6, 240  ;;  %1190 = vmatpush1.bf16.msk.msra.mxu1 %vm1853_vm4, %v1188_v54 }
 0x2fe   : > { %v687_v46 = vrot.slane %v675_v41, 4  ;;  %v893_v34 = vsel %vm522_vm12, %v1359_v47, %v1358_v48  ;;  %v892_v56 = vsel %vm522_vm12, %v1358_v48, %v1359_v47  ;;  %vm2126_vm11 = vcmp.lt.s32.totalorder %v1768_v5, 15 }
 0x2ff   : > { %v895_v57 = vsel %vm2125_vm3, %v893_v34, 0.0  ;;  %v681_v58 = vsel %vm2126_vm11, %v1353_v52, %v1354_v49  ;;  %vm2127_vm15 = vmmov %vm2126_vm11  ;;  %v1367_v59 = vpop.permute.xlu1 %1366  ;;  %v1362_v60 = vpop.permute.xlu0 %1361  ;;  %v692_v1 = vsel %vm308_vm1, %v668_v50, %v688_v43  ;;  %v906_v9 = vrot.slane %v892_v56, 4 }
 0x300   : > { %v691_v55 = vsel %vm308_vm1, %v667_v40, %v687_v46  ;;  %v682_v12 = vsel %vm2127_vm15, %v1354_v49, %v1353_v52  ;;  %v684_v62 = vsel %vm1793_vm10, %v681_v58, 0.0  ;;  %v1369_v6 = vunpack.i.h.bf16 %v1367_v59 }
 0x301   : > { %v683_v61 = vsel %vm1840_vm0, %v682_v12, 0.0  ;;  %v1368_v4 = vunpack.i.l.bf16 %v1367_v59  ;;  %v1364_v7 = vunpack.i.h.bf16 %v1362_v60  ;;  %v1363_v8 = vunpack.i.l.bf16 %v1362_v60  ;;  %vm2129_vm0 = vmmov %vm2128_vm7 }
 0x302   : > { %v1194_v2 = vpack.c.bf16 %v683_v61, %v691_v55  ;;  %v907_v10 = vrot.slane %v895_v57, 4  ;;  %v1191_v14 = vpack.c.bf16 %v684_v62, %v692_v1  ;;  %vm2130_vm10 = vcmp.lt.s32.totalorder %v1768_v5, 113 }
 0x303   : > { %v900_v42 = vsel %vm2128_vm7, %v1368_v4, %v1369_v6  ;;  %v901_v18 = vsel %vm2129_vm0, %v1369_v6, %v1368_v4  ;;  %v884_v16 = vsel %vm2130_vm10, %v1363_v8, %v1364_v7  ;;  %vm2131_vm12 = vmmov %vm2130_vm10  ;;  %vm2132_vm5 = vcmask 97280  }
 0x304   : > { %v885_v17 = vsel %vm2131_vm12, %v1364_v7, %v1363_v8  ;;  %1153 = vmatmul.mubr.msk.f32.vlgmr.msra.gmra.mrb[0].mxu1 %vm2132_vm5, %v719_v63  ;;  %v903_v19 = vsel %vm1889_vm9, %v901_v18, 0.0  ;;  %v886_v21 = vsel %vm1780_vm6, %v884_v16, 0.0  ;;  %1193 = vmatprep.subr.msk.bf16.mxu1 %vm1853_vm4, %v1191_v14  ;;  %v902_v5 = vsel %vm1788_vm8, %v900_v42, 0.0  ;;  %vm2133_vm6 = vmmov %vm2132_vm5 }
 0x305   : > { %v887_v22 = vsel %vm1881_vm2, %v885_v17, 0.0  ;;  %873 = vmatprep.mubr.f32.mxu1 %v1541_v3  ;;  %v910_v23 = vsel %vm308_vm1, %v886_v21, %v906_v9  ;;  %1196 = vmatpush1.bf16.msk.msra.mxu1 %vm1853_vm4, %v1194_v2  ;;  %vm2134_vm8 = vmmov %vm2132_vm5 }
 0x306   : > { %v911_v20 = vsel %vm308_vm1, %v887_v22, %v907_v10  ;;  %v1200_v24 = vpack.c.bf16 %v902_v5, %v910_v23 }
 0x307   : > { %v1197_v11 = vpack.c.bf16 %v903_v19, %v911_v20 }
 0x309   : > { %1199 = vmatprep.subr.msk.bf16.mxu1 %vm1853_vm4, %v1197_v11 }
 0x30c   : > { %1156 = vmatmul.mubr.msk.f32.vlgmr.msra.gmra.mrb[0].mxu1 %vm2133_vm6, %v693_v25 }
 0x30d   : > { %1202 = vmatpush1.bf16.msk.msra.mxu1 %vm1853_vm4, %v1200_v24  ;;  %987 = vmatprep.mubr.f32.mxu1 %v1541_v3 }
 0x314   : > { %1159 = vmatmul.mubr.msk.f32.vlgmr.msra.gmra.mrb[0].mxu1 %vm2134_vm8, %v913_v13 }
 0x3e7   : > { %v989_v15 = vpop.f32.mrb[0].mxu1 }
 0x3e8   : > { %v1001_v26 = vmul.f32 %v989_v15, %v989_v15  ;;  %v991_v27 = vpop.f32.mrb[1].mxu1  ;;  %v996_v28 = vsel %vm308_vm1, %v989_v15, 0.0 }
 0x3e9   : > { %v997_v29 = vsel %vm308_vm1, %v991_v27, 0.0  ;;  %v1002_v30 = vmul.f32 %v991_v27, %v991_v27 }
 0x3ea   : > { %v998_v31 = vadd.f32 %v997_v29, %v996_v28  ;;  %v1003_v32 = vsel %vm308_vm1, %v1001_v26, 0.0 }
 0x3eb   : > { %v1004_v33 = vsel %vm308_vm1, %v1002_v30, 0.0 }
 0x3ec   : > { %999 = vadd.xlane.f32.xlu0 %v998_v31  ;;  %v1005_v51 = vadd.f32 %v1004_v33, %v1003_v32 }
 0x3ee   : > { %1006 = vadd.xlane.f32.xlu1 %v1005_v51 }
 0x479   : > { %v1000_v3 = vpop.xlane.xlu0 %999 }
 0x47a   : > { %v1008_v35 = vmul.f32 0.00390625, %v1000_v3 }
 0x47b   : > { %v1007_v36 = vpop.xlane.xlu1 %1006 }
 0x47c   : > { %v1009_v37 = vmul.f32 0.00390625, %v1007_v36  ;;  %v1010_v38 = vmul.f32 %v1008_v35, %v1008_v35  ;;  %v1013_v43 = vsub.f32 %v989_v15, %v1008_v35  ;;  %v1014_v44 = vsub.f32 %v991_v27, %v1008_v35 }
 0x47e   : > { %v1011_v39 = vsub.f32 %v1009_v37, %v1010_v38 }
 0x480   : > { %v1012_v40 = vmax.f32 %v1011_v39, 0.0 }
 0x482   : > { %v1015_v41 = vadd.f32 1e-05, %v1012_v40 }
 0x484   : > { %1374 = vrsqrt.f32 %v1015_v41 }
 0x48e   : > { %v1375_v45 = vpop.eup %1374 }
 0x48f   : > { %v1017_v46 = vmul.f32 %v1375_v45, %v1013_v43  ;;  %v1018_v47 = vmul.f32 %v1375_v45, %v1014_v44 }
 0x491   : > { %v1021_v48 = vcombine.low %v1017_v46, %v1018_v47 }
 0x493   : > { %v1023_v49 = vadd.f32 %v1021_v48, %v1753_v0 }
 0x495   : > { %1024 = vst [vmem:[%s215_s5] sm:$0xff] %v1023_v49 }
 0x496   : > { %1475 = shalt.err (!%p1472_p2)
}
 0x497   : > { %s1476_s8 = scalar_lea.hbm %s2030_s7, 128  ;;  %s1480_s24 = scalar_lea.hbm %s2077_s3, 256 }
 0x498   : > { %p1477_p13 = scmp.ne.s32.totalorder %s2030_s7, %s1476_s8  ;;  %p1481_p4 = scmp.lt.u32.totalorder %s2030_s7, %s2077_s3 }
 0x499   : > { %p1482_p5 = scmp.lt.u32.totalorder %s1480_s24, %s1476_s8  ;;  %p1484_p11 = scmp.lt.u32.totalorder %s1476_s8, %s2030_s7 }
 0x49a   : > { %p1478_p6 = pnand %p1477_p13, %p2135_p0 }
 0x49b   : > { %p1483_p8 = por %p1482_p5, %p1481_p4 }
 0x49c   : > { %p1479_p10 = pneg %p1478_p6 }
 0x49d   : > { %p1485_p1 = por %p1484_p11, %p1483_p8 }
 0x49f   : > { %p1486_p3 = pnand %p1485_p1, %p1479_p10 }
 0x4a1   : > { %1489 = shalt.err (!%p1486_p3)
}
 0x4a2   : > { %1221 = dma.vmem_to_hbm [thread:$0]  (%p2135_p0), %s2032_s10, 128, %s2030_s7, %s1026_s28  }
 0x4a3 PF: > { %s1052_s29 = sand.u32 1, %s1520_s12   ;;  %p2136_p7 = scmp.ne.s32.totalorder %s2091_s19, 0 }
 0x4a4   : > { %p2137_p9 = scmp.ge.s32.totalorder %s1532_s15, 2  ;;  %s1053_s30 = scalar_lea.sflag [#allocation4], %s1052_s29 }
 0x4a6   : > { %p1235_p12 = pnand %p2137_p9, %p2136_p7 }
 0x4a8   : > { %1515 = dma.done.wait (!%p1235_p12), %s1053_s30, 128  }
 0x4a9   : > { %1517 = vsyncadd (!%p1235_p12), %s1053_s30, 4294967168  ;;  %p17_p2 = scmp.ge.s32.totalorder %s1680_s4, 4   ;;  %s2138_s12 = smov %s1524_s13 }
 0x4aa   : > { %s2139_s13 = smov %s1528_s14  ;;  %s2140_s14 = smov %s1696_s9 }
 0x4ab   : > { %s2141_s15 = smov %s1680_s4  ;;  %19 = sbr.rel (!%p17_p2) target bundleno = 6 (0x6), region = 89 }
 0x4b2   :  { %1058 = vsyncpa [#allocation3], 1 }
 0x4b3   :  { %1060 = vsyncpa [#allocation3 + $0x1], 1 }
 0x4b4   :  { %1061 = vsyncpa [#allocation6], 1 }
 0x4b5   :  { %1062 = vsyncpa [#allocation4], 1 }
 0x4b6   :  { %1064 = vsyncpa [#allocation4 + $0x1], 1 }

</bundles_post_ra>
